<compile_context>
chip_gen: v6e
topology: v6e:2x2x1
jax: 0.10.0
libtpu: 0.0.40
codegen_flags: <defaults>
</compile_context>

<pallas_src>
import functools

import jax
import jax.numpy as jnp
from jax.experimental import pallas as pl
from jax.experimental.pallas import tpu as pltpu  # noqa: F401  (TPU backend assumed)

IM_CHANNELS = 3
ACTION_DIM = 6
BELIEF_DIM = 32
DEC_HIDDEN = 256


# ----------------------------------------------------------------------------
# Pallas kernels
# ----------------------------------------------------------------------------
def _linear_kernel(x_ref, w_ref, b_ref, o_ref, *, act):
    """Single-block y = act(x @ w + b); whole operands resident in VMEM."""
    y = jnp.dot(x_ref[...], w_ref[...], preferred_element_type=jnp.float32)
    y = y + b_ref[...]
    if act == "relu":
        y = jnp.maximum(y, 0.0)
    elif act == "sigmoid":
        y = jax.nn.sigmoid(y)
    o_ref[...] = y


def pallas_linear(x, w, b, act="none"):
    """y = act(x @ w + b), one block, no grid (M is tiny here)."""
    M, _ = x.shape
    N = w.shape[1]
    return pl.pallas_call(
        functools.partial(_linear_kernel, act=act),
        out_shape=jax.ShapeDtypeStruct((M, N), jnp.float32),
    )(x.astype(jnp.float32), w.astype(jnp.float32),
      b.reshape(1, N).astype(jnp.float32))


def _gru_from_refs(x, h, wih_ref, whh_ref, bih_ref, bhh_ref):
    """PyTorch GRU-cell math, gate order (r, z, n), gates pre-split per ref[g]."""
    f32 = jnp.float32

    def gates(g):
        gi = jnp.dot(x, wih_ref[g], preferred_element_type=f32) + bih_ref[g]
        gh = jnp.dot(h, whh_ref[g], preferred_element_type=f32) + bhh_ref[g]
        return gi, gh

    gi_r, gh_r = gates(0)
    gi_z, gh_z = gates(1)
    gi_n, gh_n = gates(2)
    r = jax.nn.sigmoid(gi_r + gh_r)
    z = jax.nn.sigmoid(gi_z + gh_z)
    n = jnp.tanh(gi_n + r * gh_n)
    return (1.0 - z) * n + z * h


def _fused_pipeline_kernel(feat_ref, aoh_ref, mask_ref,
                           ew3_ref, eb3_ref,
                           mu_wih_ref, mu_whh_ref, mu_bih_ref, mu_bhh_ref,
                           aw_ref, ab_ref,
                           ap_wih_ref, ap_whh_ref, ap_bih_ref, ap_bhh_ref,
                           ffw_ref, ffb_ref,
                           dw1_ref, db1_ref, dw2_ref, db2_ref,
                           opred_ref, belief_ref):
    """Whole post-conv step in one kernel: all weights stay in VMEM, no
    intermediate activation touches HBM."""
    f32 = jnp.float32

    # encode_obs: final encoder linear + ReLU
    feat = feat_ref[...]
    obs_enc = jnp.maximum(
        jnp.dot(feat, ew3_ref[...], preferred_element_type=f32) + eb3_ref[...], 0.0)
    B, D = obs_enc.shape

    # update_belief_maybe: belief is None at t=0 -> zero hidden state, p == 1
    h0 = jnp.zeros((B, D), f32)
    belief = _gru_from_refs(obs_enc, h0, mu_wih_ref, mu_whh_ref, mu_bih_ref, mu_bhh_ref)

    # propagate_action_conseq (skip_null_action=True)
    act_enc = jnp.maximum(
        jnp.dot(aoh_ref[...], aw_ref[...], preferred_element_type=f32) + ab_ref[...], 0.0)
    updated = _gru_from_refs(act_enc, belief, ap_wih_ref, ap_whh_ref, ap_bih_ref, ap_bhh_ref)
    m = mask_ref[...]                                   # (B,1): 0 for null action id 0
    belief = m * updated + (1.0 - m) * belief

    # propagate_env_conseq (SigmoidFF)
    belief = jax.nn.sigmoid(
        jnp.dot(belief, ffw_ref[...], preferred_element_type=f32) + ffb_ref[...])

    # decode_belief: linear -> relu -> linear -> sigmoid
    d = jnp.maximum(
        jnp.dot(belief, dw1_ref[...], preferred_element_type=f32) + db1_ref[...], 0.0)
    o = jax.nn.sigmoid(
        jnp.dot(d, dw2_ref[...], preferred_element_type=f32) + db2_ref[...])

    opred_ref[...] = o                                  # (B, 768): lane-dense store
    belief_ref[...] = belief


# ----------------------------------------------------------------------------
# Conv wrapper: NHWC, tap-concat im2col (no transposes), single-block matmul
# ----------------------------------------------------------------------------
def conv2d_relu_nhwc(x, w_hwio, b, stride=2, pad=1):
    """x:(B,H,W,Cin) NHWC, w:(kh,kw,Cin,Cout) HWIO -> (B,Ho,Wo,Cout), fused ReLU."""
    B, H, W, Cin = x.shape
    kh, kw, _, Cout = w_hwio.shape
    Ho = (H + 2 * pad - kh) // stride + 1
    Wo = (W + 2 * pad - kw) // stride + 1
    xp = jnp.pad(x, ((0, 0), (pad, pad), (pad, pad), (0, 0)))
    # Static strided tap slices in NHWC; concatenate along the channel axis so
    # the patch feature order is (tap-major, cin-minor) == w_hwio flatten order.
    cols = [xp[:, i:i + stride * Ho:stride, j:j + stride * Wo:stride, :]
            for i in range(kh) for j in range(kw)]
    patches = jnp.concatenate(cols, axis=-1).reshape(B * Ho * Wo, kh * kw * Cin)
    w2d = w_hwio.reshape(kh * kw * Cin, Cout)
    y = pallas_linear(patches, w2d, b, act="relu")      # (B*Ho*Wo, Cout)
    return y.reshape(B, Ho, Wo, Cout)                   # stays NHWC, no transpose


# ----------------------------------------------------------------------------
# Parameters (deterministic synthetic init; layouts chosen for the kernels)
# ----------------------------------------------------------------------------
def make_params(key):
    ks = jax.random.split(key, 20)
    s = 0.05
    D = BELIEF_DIM
    p = {}
    # Encoder: conv(3x3,s2) -> conv(3x3,s2) -> flatten(NHWC) -> linear -> belief
    p["e_w1"] = s * jax.random.normal(ks[0], (3, 3, IM_CHANNELS, 16))
    p["e_b1"] = s * jax.random.normal(ks[1], (16,))
    p["e_w2"] = s * jax.random.normal(ks[2], (3, 3, 16, 32))
    p["e_b2"] = s * jax.random.normal(ks[3], (32,))
    p["e_w3"] = s * jax.random.normal(ks[4], (4 * 4 * 32, D))
    p["e_b3"] = s * jax.random.normal(ks[5], (D,))
    # ActionEncoder: linear(action_dim -> belief_dim) on one-hot actions
    p["a_w"] = s * jax.random.normal(ks[6], (ACTION_DIM, D))
    p["a_b"] = s * jax.random.normal(ks[7], (D,))
    # StatePropagator GRUs, gate weights pre-split: (3, in, D), gate order (r,z,n)
    p["mu_wih"] = s * jax.random.normal(ks[8], (3, D, D))
    p["mu_whh"] = s * jax.random.normal(ks[9], (3, D, D))
    p["mu_bih"] = s * jax.random.normal(ks[10], (3, D))
    p["mu_bhh"] = s * jax.random.normal(ks[11], (3, D))
    p["ap_wih"] = s * jax.random.normal(ks[12], (3, D, D))
    p["ap_whh"] = s * jax.random.normal(ks[13], (3, D, D))
    p["ap_bih"] = s * jax.random.normal(ks[14], (3, D))
    p["ap_bhh"] = s * jax.random.normal(ks[15], (3, D))
    # SigmoidFF (env_propagator)
    p["ff_w"] = s * jax.random.normal(ks[16], (D, D))
    p["ff_b"] = s * jax.random.normal(ks[17], (D,))
    # Decoder: linear -> relu -> linear -> sigmoid -> flat image
    p["d_w1"] = s * jax.random.normal(ks[18], (D, DEC_HIDDEN))
    p["d_b1"] = jnp.zeros((DEC_HIDDEN,))
    p["d_w2"] = s * jax.random.normal(ks[19], (DEC_HIDDEN, IM_CHANNELS * 16 * 16))
    p["d_b2"] = jnp.zeros((IM_CHANNELS * 16 * 16,))
    return p


# ----------------------------------------------------------------------------
# One predict_full step (t=0): belief=None, p=1, skip_null_action=True
# ----------------------------------------------------------------------------
def ae_predictor_step(p, obs_nchw, action):
    B = obs_nchw.shape[0]
    x = jnp.transpose(obs_nchw, (0, 2, 3, 1)).astype(jnp.float32)  # NCHW->NHWC once
    h = conv2d_relu_nhwc(x, p["e_w1"], p["e_b1"])                  # (B, 8, 8, 16)
    h = conv2d_relu_nhwc(h, p["e_w2"], p["e_b2"])                  # (B, 4, 4, 32)
    feat = h.reshape(B, -1)                                        # (B, 512) NHWC flatten

    a_onehot = jax.nn.one_hot(action, ACTION_DIM, dtype=jnp.float32)
    keep_mask = (action != 0).astype(jnp.float32).reshape(B, 1)    # 0 -> keep old belief

    o_flat, belief = pl.pallas_call(
        _fused_pipeline_kernel,
        out_shape=(jax.ShapeDtypeStruct((B, IM_CHANNELS * 16 * 16), jnp.float32),
                   jax.ShapeDtypeStruct((B, BELIEF_DIM), jnp.float32)),
    )(feat, a_onehot, keep_mask,
      p["e_w3"], p["e_b3"].reshape(1, -1),
      p["mu_wih"], p["mu_whh"],
      p["mu_bih"].reshape(3, 1, -1), p["mu_bhh"].reshape(3, 1, -1),
      p["a_w"], p["a_b"].reshape(1, -1),
      p["ap_wih"], p["ap_whh"],
      p["ap_bih"].reshape(3, 1, -1), p["ap_bhh"].reshape(3, 1, -1),
      p["ff_w"], p["ff_b"].reshape(1, -1),
      p["d_w1"], p["d_b1"].reshape(1, -1),
      p["d_w2"], p["d_b2"].reshape(1, -1))

    o_pred = o_flat.reshape(B, IM_CHANNELS, 16, 16)
    return o_pred, belief


# ----------------------------------------------------------------------------
# Pure-JAX reference (independent conv via lax.conv_general_dilated)
# ----------------------------------------------------------------------------
def ae_predictor_step_ref(p, obs_nchw, action):
    B = obs_nchw.shape[0]
    x = jnp.transpose(obs_nchw, (0, 2, 3, 1)).astype(jnp.float32)

    def conv(xv, w, b):
        y = jax.lax.conv_general_dilated(
            xv, w, window_strides=(2, 2), padding=[(1, 1), (1, 1)],
            dimension_numbers=("NHWC", "HWIO", "NHWC"))
        return jnp.maximum(y + b, 0.0)

    def gru(xv, hv, wih, whh, bih, bhh):
        r = jax.nn.sigmoid(xv @ wih[0] + bih[0] + hv @ whh[0] + bhh[0])
        z = jax.nn.sigmoid(xv @ wih[1] + bih[1] + hv @ whh[1] + bhh[1])
        n = jnp.tanh(xv @ wih[2] + bih[2] + r * (hv @ whh[2] + bhh[2]))
        return (1.0 - z) * n + z * hv

    h = conv(x, p["e_w1"], p["e_b1"])
    h = conv(h, p["e_w2"], p["e_b2"])
    feat = h.reshape(B, -1)
    obs_enc = jnp.maximum(feat @ p["e_w3"] + p["e_b3"], 0.0)
    belief = gru(obs_enc, jnp.zeros((B, BELIEF_DIM), jnp.float32),
                 p["mu_wih"], p["mu_whh"], p["mu_bih"], p["mu_bhh"])
    a_oh = jax.nn.one_hot(action, ACTION_DIM, dtype=jnp.float32)
    act_enc = jnp.maximum(a_oh @ p["a_w"] + p["a_b"], 0.0)
    updated = gru(act_enc, belief, p["ap_wih"], p["ap_whh"], p["ap_bih"], p["ap_bhh"])
    m = (action != 0).astype(jnp.float32)[:, None]
    belief = m * updated + (1.0 - m) * belief
    belief = jax.nn.sigmoid(belief @ p["ff_w"] + p["ff_b"])
    d = jnp.maximum(belief @ p["d_w1"] + p["d_b1"], 0.0)
    o = jax.nn.sigmoid(d @ p["d_w2"] + p["d_b2"])
    return o.reshape(B, IM_CHANNELS, 16, 16), belief


if __name__ == "__main__":
    B, C, H, W = 2, IM_CHANNELS, 16, 16
    key = jax.random.PRNGKey(0)
    k_obs, k_par = jax.random.split(key, 2)

    obs = jax.random.uniform(k_obs, (B, C, H, W), dtype=jnp.float32)
    action = jnp.array([0, 3], dtype=jnp.int32)   # action 0 exercises skip_null_action
    params = make_params(k_par)

    step = jax.jit(ae_predictor_step)
    o_pred, belief = step(params, obs, action)
    jax.block_until_ready((o_pred, belief))

    o_ref, b_ref = ae_predictor_step_ref(params, obs, action)
    assert o_pred.shape == (B, C, H, W) and belief.shape == (B, BELIEF_DIM)
    assert jnp.allclose(o_pred, o_ref, atol=1e-4), "decoded prediction mismatch"
    assert jnp.allclose(belief, b_ref, atol=1e-4), "belief mismatch"

    # AE_Predictor.forward(x) itself returns None in the reference module.
    forward_result = None
    assert forward_result is None

    print("KERNEL_OK")
</pallas_src>

<mosaic_0001>
module attributes {stable_mosaic.version = 11 : i64} {
  func.func @_linear_kernel(%arg0: memref<128x27xf32, #tpu.memory_space<vmem>>, %arg1: memref<27x16xf32, #tpu.memory_space<vmem>>, %arg2: memref<1x16xf32, #tpu.memory_space<vmem>>, %arg3: memref<128x16xf32, #tpu.memory_space<vmem>>) attributes {dimension_semantics = [], scalar_prefetch = 0 : i64, scratch_operands = 0 : i64, tpu.core_type = #tpu.core_type<tc>} {
    %c0 = arith.constant 0 : index
    %c0_0 = arith.constant 0 : index
    %0 = vector.load %arg0[%c0, %c0_0] : memref<128x27xf32, #tpu.memory_space<vmem>>, vector<128x27xf32>
    %c0_1 = arith.constant 0 : index
    %c0_2 = arith.constant 0 : index
    %1 = vector.load %arg1[%c0_1, %c0_2] : memref<27x16xf32, #tpu.memory_space<vmem>>, vector<27x16xf32>
    %cst = arith.constant dense<0.000000e+00> : vector<128x16xf32>
    %2 = tpu.matmul %0, %1, %cst {dimension_numbers = #tpu.dot_dimension_numbers<[1], [0], [0], [1], [0, 0, 1, 1], [], []>} : vector<128x27xf32>, vector<27x16xf32>, vector<128x16xf32> -> vector<128x16xf32>
    %c0_3 = arith.constant 0 : index
    %c0_4 = arith.constant 0 : index
    %3 = vector.load %arg2[%c0_3, %c0_4] : memref<1x16xf32, #tpu.memory_space<vmem>>, vector<1x16xf32>
    %4 = vector.broadcast %3 : vector<1x16xf32> to vector<128x16xf32>
    %5 = arith.addf %2, %4 : vector<128x16xf32>
    %cst_5 = arith.constant 0.000000e+00 : f32
    %6 = vector.broadcast %cst_5 : f32 to vector<128x16xf32>
    %7 = arith.maximumf %5, %6 : vector<128x16xf32>
    %c0_6 = arith.constant 0 : index
    %c0_7 = arith.constant 0 : index
    %8 = vector.load %arg3[%c0_6, %c0_7] : memref<128x16xf32, #tpu.memory_space<vmem>>, vector<128x16xf32>
    tpu.vector_store %arg3[%c0_6, %c0_7], %7 {strides = array<i32>} : memref<128x16xf32, #tpu.memory_space<vmem>>, vector<128x16xf32>,
    return
  }
}

module attributes {stable_mosaic.version = 11 : i64} {
  func.func @_linear_kernel(%arg0: memref<32x144xf32, #tpu.memory_space<vmem>>, %arg1: memref<144x32xf32, #tpu.memory_space<vmem>>, %arg2: memref<1x32xf32, #tpu.memory_space<vmem>>, %arg3: memref<32x32xf32, #tpu.memory_space<vmem>>) attributes {dimension_semantics = [], scalar_prefetch = 0 : i64, scratch_operands = 0 : i64, tpu.core_type = #tpu.core_type<tc>} {
    %c0 = arith.constant 0 : index
    %c0_0 = arith.constant 0 : index
    %0 = vector.load %arg0[%c0, %c0_0] : memref<32x144xf32, #tpu.memory_space<vmem>>, vector<32x144xf32>
    %c0_1 = arith.constant 0 : index
    %c0_2 = arith.constant 0 : index
    %1 = vector.load %arg1[%c0_1, %c0_2] : memref<144x32xf32, #tpu.memory_space<vmem>>, vector<144x32xf32>
    %cst = arith.constant dense<0.000000e+00> : vector<32x32xf32>
    %2 = tpu.matmul %0, %1, %cst {dimension_numbers = #tpu.dot_dimension_numbers<[1], [0], [0], [1], [0, 0, 1, 1], [], []>} : vector<32x144xf32>, vector<144x32xf32>, vector<32x32xf32> -> vector<32x32xf32>
    %c0_3 = arith.constant 0 : index
    %c0_4 = arith.constant 0 : index
    %3 = vector.load %arg2[%c0_3, %c0_4] : memref<1x32xf32, #tpu.memory_space<vmem>>, vector<1x32xf32>
    %4 = vector.broadcast %3 : vector<1x32xf32> to vector<32x32xf32>
    %5 = arith.addf %2, %4 : vector<32x32xf32>
    %cst_5 = arith.constant 0.000000e+00 : f32
    %6 = vector.broadcast %cst_5 : f32 to vector<32x32xf32>
    %7 = arith.maximumf %5, %6 : vector<32x32xf32>
    %c0_6 = arith.constant 0 : index
    %c0_7 = arith.constant 0 : index
    %8 = vector.load %arg3[%c0_6, %c0_7] : memref<32x32xf32, #tpu.memory_space<vmem>>, vector<32x32xf32>
    tpu.vector_store %arg3[%c0_6, %c0_7], %7 {strides = array<i32>} : memref<32x32xf32, #tpu.memory_space<vmem>>, vector<32x32xf32>,
    return
  }
}

module attributes {stable_mosaic.version = 11 : i64} {
  func.func @_fused_pipeline_kernel(%arg0: memref<2x512xf32, #tpu.memory_space<vmem>>, %arg1: memref<2x6xf32, #tpu.memory_space<vmem>>, %arg2: memref<2x1xf32, #tpu.memory_space<vmem>>, %arg3: memref<512x32xf32, #tpu.memory_space<vmem>>, %arg4: memref<1x32xf32, #tpu.memory_space<vmem>>, %arg5: memref<3x32x32xf32, #tpu.memory_space<vmem>>, %arg6: memref<3x32x32xf32, #tpu.memory_space<vmem>>, %arg7: memref<3x1x32xf32, #tpu.memory_space<vmem>>, %arg8: memref<3x1x32xf32, #tpu.memory_space<vmem>>, %arg9: memref<6x32xf32, #tpu.memory_space<vmem>>, %arg10: memref<1x32xf32, #tpu.memory_space<vmem>>, %arg11: memref<3x32x32xf32, #tpu.memory_space<vmem>>, %arg12: memref<3x32x32xf32, #tpu.memory_space<vmem>>, %arg13: memref<3x1x32xf32, #tpu.memory_space<vmem>>, %arg14: memref<3x1x32xf32, #tpu.memory_space<vmem>>, %arg15: memref<32x32xf32, #tpu.memory_space<vmem>>, %arg16: memref<1x32xf32, #tpu.memory_space<vmem>>, %arg17: memref<32x256xf32, #tpu.memory_space<vmem>>, %arg18: memref<1x256xf32, #tpu.memory_space<vmem>>, %arg19: memref<256x768xf32, #tpu.memory_space<vmem>>, %arg20: memref<1x768xf32, #tpu.memory_space<vmem>>, %arg21: memref<2x768xf32, #tpu.memory_space<vmem>>, %arg22: memref<2x32xf32, #tpu.memory_space<vmem>>) attributes {dimension_semantics = [], scalar_prefetch = 0 : i64, scratch_operands = 0 : i64, tpu.core_type = #tpu.core_type<tc>} {
    %c0 = arith.constant 0 : index
    %c0_0 = arith.constant 0 : index
    %0 = vector.load %arg0[%c0, %c0_0] : memref<2x512xf32, #tpu.memory_space<vmem>>, vector<2x512xf32>
    %c0_1 = arith.constant 0 : index
    %c0_2 = arith.constant 0 : index
    %1 = vector.load %arg3[%c0_1, %c0_2] : memref<512x32xf32, #tpu.memory_space<vmem>>, vector<512x32xf32>
    %cst = arith.constant dense<0.000000e+00> : vector<2x32xf32>
    %2 = tpu.matmul %0, %1, %cst {dimension_numbers = #tpu.dot_dimension_numbers<[1], [0], [0], [1], [0, 0, 1, 1], [], []>} : vector<2x512xf32>, vector<512x32xf32>, vector<2x32xf32> -> vector<2x32xf32>
    %c0_3 = arith.constant 0 : index
    %c0_4 = arith.constant 0 : index
    %3 = vector.load %arg4[%c0_3, %c0_4] : memref<1x32xf32, #tpu.memory_space<vmem>>, vector<1x32xf32>
    %4 = vector.broadcast %3 : vector<1x32xf32> to vector<2x32xf32>
    %5 = arith.addf %2, %4 : vector<2x32xf32>
    %cst_5 = arith.constant 0.000000e+00 : f32
    %6 = vector.broadcast %cst_5 : f32 to vector<2x32xf32>
    %7 = arith.maximumf %5, %6 : vector<2x32xf32>
    %cst_6 = arith.constant 0.000000e+00 : f32
    %8 = vector.broadcast %cst_6 : f32 to vector<2x32xf32>
    %c0_7 = arith.constant 0 : index
    %c0_8 = arith.constant 0 : index
    %c0_9 = arith.constant 0 : index
    %9 = vector.load %arg5[%c0_7, %c0_8, %c0_9] : memref<3x32x32xf32, #tpu.memory_space<vmem>>, vector<1x32x32xf32>
    %10 = vector.shape_cast %9 : vector<1x32x32xf32> to vector<32x32xf32>
    %cst_10 = arith.constant dense<0.000000e+00> : vector<2x32xf32>
    %11 = tpu.matmul %7, %10, %cst_10 {dimension_numbers = #tpu.dot_dimension_numbers<[1], [0], [0], [1], [0, 0, 1, 1], [], []>} : vector<2x32xf32>, vector<32x32xf32>, vector<2x32xf32> -> vector<2x32xf32>
    %c0_11 = arith.constant 0 : index
    %c0_12 = arith.constant 0 : index
    %c0_13 = arith.constant 0 : index
    %12 = vector.load %arg7[%c0_11, %c0_12, %c0_13] : memref<3x1x32xf32, #tpu.memory_space<vmem>>, vector<1x1x32xf32>
    %13 = vector.shape_cast %12 : vector<1x1x32xf32> to vector<1x32xf32>
    %14 = vector.broadcast %13 : vector<1x32xf32> to vector<2x32xf32>
    %15 = arith.addf %11, %14 : vector<2x32xf32>
    %c0_14 = arith.constant 0 : index
    %c0_15 = arith.constant 0 : index
    %c0_16 = arith.constant 0 : index
    %16 = vector.load %arg6[%c0_14, %c0_15, %c0_16] : memref<3x32x32xf32, #tpu.memory_space<vmem>>, vector<1x32x32xf32>
    %17 = vector.shape_cast %16 : vector<1x32x32xf32> to vector<32x32xf32>
    %cst_17 = arith.constant dense<0.000000e+00> : vector<2x32xf32>
    %18 = tpu.matmul %8, %17, %cst_17 {dimension_numbers = #tpu.dot_dimension_numbers<[1], [0], [0], [1], [0, 0, 1, 1], [], []>} : vector<2x32xf32>, vector<32x32xf32>, vector<2x32xf32> -> vector<2x32xf32>
    %c0_18 = arith.constant 0 : index
    %c0_19 = arith.constant 0 : index
    %c0_20 = arith.constant 0 : index
    %19 = vector.load %arg8[%c0_18, %c0_19, %c0_20] : memref<3x1x32xf32, #tpu.memory_space<vmem>>, vector<1x1x32xf32>
    %20 = vector.shape_cast %19 : vector<1x1x32xf32> to vector<1x32xf32>
    %21 = vector.broadcast %20 : vector<1x32xf32> to vector<2x32xf32>
    %22 = arith.addf %18, %21 : vector<2x32xf32>
    %c1 = arith.constant 1 : index
    %c0_21 = arith.constant 0 : index
    %c0_22 = arith.constant 0 : index
    %23 = vector.load %arg5[%c1, %c0_21, %c0_22] : memref<3x32x32xf32, #tpu.memory_space<vmem>>, vector<1x32x32xf32>
    %24 = vector.shape_cast %23 : vector<1x32x32xf32> to vector<32x32xf32>
    %cst_23 = arith.constant dense<0.000000e+00> : vector<2x32xf32>
    %25 = tpu.matmul %7, %24, %cst_23 {dimension_numbers = #tpu.dot_dimension_numbers<[1], [0], [0], [1], [0, 0, 1, 1], [], []>} : vector<2x32xf32>, vector<32x32xf32>, vector<2x32xf32> -> vector<2x32xf32>
    %c1_24 = arith.constant 1 : index
    %c0_25 = arith.constant 0 : index
    %c0_26 = arith.constant 0 : index
    %26 = vector.load %arg7[%c1_24, %c0_25, %c0_26] : memref<3x1x32xf32, #tpu.memory_space<vmem>>, vector<1x1x32xf32>
    %27 = vector.shape_cast %26 : vector<1x1x32xf32> to vector<1x32xf32>
    %28 = vector.broadcast %27 : vector<1x32xf32> to vector<2x32xf32>
    %29 = arith.addf %25, %28 : vector<2x32xf32>
    %c1_27 = arith.constant 1 : index
    %c0_28 = arith.constant 0 : index
    %c0_29 = arith.constant 0 : index
    %30 = vector.load %arg6[%c1_27, %c0_28, %c0_29] : memref<3x32x32xf32, #tpu.memory_space<vmem>>, vector<1x32x32xf32>
    %31 = vector.shape_cast %30 : vector<1x32x32xf32> to vector<32x32xf32>
    %cst_30 = arith.constant dense<0.000000e+00> : vector<2x32xf32>
    %32 = tpu.matmul %8, %31, %cst_30 {dimension_numbers = #tpu.dot_dimension_numbers<[1], [0], [0], [1], [0, 0, 1, 1], [], []>} : vector<2x32xf32>, vector<32x32xf32>, vector<2x32xf32> -> vector<2x32xf32>
    %c1_31 = arith.constant 1 : index
    %c0_32 = arith.constant 0 : index
    %c0_33 = arith.constant 0 : index
    %33 = vector.load %arg8[%c1_31, %c0_32, %c0_33] : memref<3x1x32xf32, #tpu.memory_space<vmem>>, vector<1x1x32xf32>
    %34 = vector.shape_cast %33 : vector<1x1x32xf32> to vector<1x32xf32>
    %35 = vector.broadcast %34 : vector<1x32xf32> to vector<2x32xf32>
    %36 = arith.addf %32, %35 : vector<2x32xf32>
    %c2 = arith.constant 2 : index
    %c0_34 = arith.constant 0 : index
    %c0_35 = arith.constant 0 : index
    %37 = vector.load %arg5[%c2, %c0_34, %c0_35] : memref<3x32x32xf32, #tpu.memory_space<vmem>>, vector<1x32x32xf32>
    %38 = vector.shape_cast %37 : vector<1x32x32xf32> to vector<32x32xf32>
    %cst_36 = arith.constant dense<0.000000e+00> : vector<2x32xf32>
    %39 = tpu.matmul %7, %38, %cst_36 {dimension_numbers = #tpu.dot_dimension_numbers<[1], [0], [0], [1], [0, 0, 1, 1], [], []>} : vector<2x32xf32>, vector<32x32xf32>, vector<2x32xf32> -> vector<2x32xf32>
    %c2_37 = arith.constant 2 : index
    %c0_38 = arith.constant 0 : index
    %c0_39 = arith.constant 0 : index
    %40 = vector.load %arg7[%c2_37, %c0_38, %c0_39] : memref<3x1x32xf32, #tpu.memory_space<vmem>>, vector<1x1x32xf32>
    %41 = vector.shape_cast %40 : vector<1x1x32xf32> to vector<1x32xf32>
    %42 = vector.broadcast %41 : vector<1x32xf32> to vector<2x32xf32>
    %43 = arith.addf %39, %42 : vector<2x32xf32>
    %c2_40 = arith.constant 2 : index
    %c0_41 = arith.constant 0 : index
    %c0_42 = arith.constant 0 : index
    %44 = vector.load %arg6[%c2_40, %c0_41, %c0_42] : memref<3x32x32xf32, #tpu.memory_space<vmem>>, vector<1x32x32xf32>
    %45 = vector.shape_cast %44 : vector<1x32x32xf32> to vector<32x32xf32>
    %cst_43 = arith.constant dense<0.000000e+00> : vector<2x32xf32>
    %46 = tpu.matmul %8, %45, %cst_43 {dimension_numbers = #tpu.dot_dimension_numbers<[1], [0], [0], [1], [0, 0, 1, 1], [], []>} : vector<2x32xf32>, vector<32x32xf32>, vector<2x32xf32> -> vector<2x32xf32>
    %c2_44 = arith.constant 2 : index
    %c0_45 = arith.constant 0 : index
    %c0_46 = arith.constant 0 : index
    %47 = vector.load %arg8[%c2_44, %c0_45, %c0_46] : memref<3x1x32xf32, #tpu.memory_space<vmem>>, vector<1x1x32xf32>
    %48 = vector.shape_cast %47 : vector<1x1x32xf32> to vector<1x32xf32>
    %49 = vector.broadcast %48 : vector<1x32xf32> to vector<2x32xf32>
    %50 = arith.addf %46, %49 : vector<2x32xf32>
    %51 = arith.addf %15, %22 : vector<2x32xf32>
    %52 = arith.negf %51 : vector<2x32xf32>
    %53 = math.exp %52 : vector<2x32xf32>
    %cst_47 = arith.constant 1.000000e+00 : f32
    %54 = vector.broadcast %cst_47 : f32 to vector<2x32xf32>
    %55 = arith.addf %54, %53 : vector<2x32xf32>
    %56 = arith.divf %54, %55 : vector<2x32xf32>
    %57 = arith.addf %29, %36 : vector<2x32xf32>
    %58 = arith.negf %57 : vector<2x32xf32>
    %59 = math.exp %58 : vector<2x32xf32>
    %cst_48 = arith.constant 1.000000e+00 : f32
    %60 = vector.broadcast %cst_48 : f32 to vector<2x32xf32>
    %61 = arith.addf %60, %59 : vector<2x32xf32>
    %62 = arith.divf %60, %61 : vector<2x32xf32>
    %63 = arith.mulf %56, %50 : vector<2x32xf32>
    %64 = arith.addf %43, %63 : vector<2x32xf32>
    %65 = math.tanh %64 : vector<2x32xf32>
    %cst_49 = arith.constant 1.000000e+00 : f32
    %66 = vector.broadcast %cst_49 : f32 to vector<2x32xf32>
    %67 = arith.subf %66, %62 : vector<2x32xf32>
    %68 = arith.mulf %67, %65 : vector<2x32xf32>
    %69 = arith.mulf %62, %8 : vector<2x32xf32>
    %70 = arith.addf %68, %69 : vector<2x32xf32>
    %c0_50 = arith.constant 0 : index
    %c0_51 = arith.constant 0 : index
    %71 = vector.load %arg1[%c0_50, %c0_51] : memref<2x6xf32, #tpu.memory_space<vmem>>, vector<2x6xf32>
    %c0_52 = arith.constant 0 : index
    %c0_53 = arith.constant 0 : index
    %72 = vector.load %arg9[%c0_52, %c0_53] : memref<6x32xf32, #tpu.memory_space<vmem>>, vector<6x32xf32>
    %cst_54 = arith.constant dense<0.000000e+00> : vector<2x32xf32>
    %73 = tpu.matmul %71, %72, %cst_54 {dimension_numbers = #tpu.dot_dimension_numbers<[1], [0], [0], [1], [0, 0, 1, 1], [], []>} : vector<2x6xf32>, vector<6x32xf32>, vector<2x32xf32> -> vector<2x32xf32>
    %c0_55 = arith.constant 0 : index
    %c0_56 = arith.constant 0 : index
    %74 = vector.load %arg10[%c0_55, %c0_56] : memref<1x32xf32, #tpu.memory_space<vmem>>, vector<1x32xf32>
    %75 = vector.broadcast %74 : vector<1x32xf32> to vector<2x32xf32>
    %76 = arith.addf %73, %75 : vector<2x32xf32>
    %cst_57 = arith.constant 0.000000e+00 : f32
    %77 = vector.broadcast %cst_57 : f32 to vector<2x32xf32>
    %78 = arith.maximumf %76, %77 : vector<2x32xf32>
    %c0_58 = arith.constant 0 : index
    %c0_59 = arith.constant 0 : index
    %c0_60 = arith.constant 0 : index
    %79 = vector.load %arg11[%c0_58, %c0_59, %c0_60] : memref<3x32x32xf32, #tpu.memory_space<vmem>>, vector<1x32x32xf32>
    %80 = vector.shape_cast %79 : vector<1x32x32xf32> to vector<32x32xf32>
    %cst_61 = arith.constant dense<0.000000e+00> : vector<2x32xf32>
    %81 = tpu.matmul %78, %80, %cst_61 {dimension_numbers = #tpu.dot_dimension_numbers<[1], [0], [0], [1], [0, 0, 1, 1], [], []>} : vector<2x32xf32>, vector<32x32xf32>, vector<2x32xf32> -> vector<2x32xf32>
    %c0_62 = arith.constant 0 : index
    %c0_63 = arith.constant 0 : index
    %c0_64 = arith.constant 0 : index
    %82 = vector.load %arg13[%c0_62, %c0_63, %c0_64] : memref<3x1x32xf32, #tpu.memory_space<vmem>>, vector<1x1x32xf32>
    %83 = vector.shape_cast %82 : vector<1x1x32xf32> to vector<1x32xf32>
    %84 = vector.broadcast %83 : vector<1x32xf32> to vector<2x32xf32>
    %85 = arith.addf %81, %84 : vector<2x32xf32>
    %c0_65 = arith.constant 0 : index
    %c0_66 = arith.constant 0 : index
    %c0_67 = arith.constant 0 : index
    %86 = vector.load %arg12[%c0_65, %c0_66, %c0_67] : memref<3x32x32xf32, #tpu.memory_space<vmem>>, vector<1x32x32xf32>
    %87 = vector.shape_cast %86 : vector<1x32x32xf32> to vector<32x32xf32>
    %cst_68 = arith.constant dense<0.000000e+00> : vector<2x32xf32>
    %88 = tpu.matmul %70, %87, %cst_68 {dimension_numbers = #tpu.dot_dimension_numbers<[1], [0], [0], [1], [0, 0, 1, 1], [], []>} : vector<2x32xf32>, vector<32x32xf32>, vector<2x32xf32> -> vector<2x32xf32>
    %c0_69 = arith.constant 0 : index
    %c0_70 = arith.constant 0 : index
    %c0_71 = arith.constant 0 : index
    %89 = vector.load %arg14[%c0_69, %c0_70, %c0_71] : memref<3x1x32xf32, #tpu.memory_space<vmem>>, vector<1x1x32xf32>
    %90 = vector.shape_cast %89 : vector<1x1x32xf32> to vector<1x32xf32>
    %91 = vector.broadcast %90 : vector<1x32xf32> to vector<2x32xf32>
    %92 = arith.addf %88, %91 : vector<2x32xf32>
    %c1_72 = arith.constant 1 : index
    %c0_73 = arith.constant 0 : index
    %c0_74 = arith.constant 0 : index
    %93 = vector.load %arg11[%c1_72, %c0_73, %c0_74] : memref<3x32x32xf32, #tpu.memory_space<vmem>>, vector<1x32x32xf32>
    %94 = vector.shape_cast %93 : vector<1x32x32xf32> to vector<32x32xf32>
    %cst_75 = arith.constant dense<0.000000e+00> : vector<2x32xf32>
    %95 = tpu.matmul %78, %94, %cst_75 {dimension_numbers = #tpu.dot_dimension_numbers<[1], [0], [0], [1], [0, 0, 1, 1], [], []>} : vector<2x32xf32>, vector<32x32xf32>, vector<2x32xf32> -> vector<2x32xf32>
    %c1_76 = arith.constant 1 : index
    %c0_77 = arith.constant 0 : index
    %c0_78 = arith.constant 0 : index
    %96 = vector.load %arg13[%c1_76, %c0_77, %c0_78] : memref<3x1x32xf32, #tpu.memory_space<vmem>>, vector<1x1x32xf32>
    %97 = vector.shape_cast %96 : vector<1x1x32xf32> to vector<1x32xf32>
    %98 = vector.broadcast %97 : vector<1x32xf32> to vector<2x32xf32>
    %99 = arith.addf %95, %98 : vector<2x32xf32>
    %c1_79 = arith.constant 1 : index
    %c0_80 = arith.constant 0 : index
    %c0_81 = arith.constant 0 : index
    %100 = vector.load %arg12[%c1_79, %c0_80, %c0_81] : memref<3x32x32xf32, #tpu.memory_space<vmem>>, vector<1x32x32xf32>
    %101 = vector.shape_cast %100 : vector<1x32x32xf32> to vector<32x32xf32>
    %cst_82 = arith.constant dense<0.000000e+00> : vector<2x32xf32>
    %102 = tpu.matmul %70, %101, %cst_82 {dimension_numbers = #tpu.dot_dimension_numbers<[1], [0], [0], [1], [0, 0, 1, 1], [], []>} : vector<2x32xf32>, vector<32x32xf32>, vector<2x32xf32> -> vector<2x32xf32>
    %c1_83 = arith.constant 1 : index
    %c0_84 = arith.constant 0 : index
    %c0_85 = arith.constant 0 : index
    %103 = vector.load %arg14[%c1_83, %c0_84, %c0_85] : memref<3x1x32xf32, #tpu.memory_space<vmem>>, vector<1x1x32xf32>
    %104 = vector.shape_cast %103 : vector<1x1x32xf32> to vector<1x32xf32>
    %105 = vector.broadcast %104 : vector<1x32xf32> to vector<2x32xf32>
    %106 = arith.addf %102, %105 : vector<2x32xf32>
    %c2_86 = arith.constant 2 : index
    %c0_87 = arith.constant 0 : index
    %c0_88 = arith.constant 0 : index
    %107 = vector.load %arg11[%c2_86, %c0_87, %c0_88] : memref<3x32x32xf32, #tpu.memory_space<vmem>>, vector<1x32x32xf32>
    %108 = vector.shape_cast %107 : vector<1x32x32xf32> to vector<32x32xf32>
    %cst_89 = arith.constant dense<0.000000e+00> : vector<2x32xf32>
    %109 = tpu.matmul %78, %108, %cst_89 {dimension_numbers = #tpu.dot_dimension_numbers<[1], [0], [0], [1], [0, 0, 1, 1], [], []>} : vector<2x32xf32>, vector<32x32xf32>, vector<2x32xf32> -> vector<2x32xf32>
    %c2_90 = arith.constant 2 : index
    %c0_91 = arith.constant 0 : index
    %c0_92 = arith.constant 0 : index
    %110 = vector.load %arg13[%c2_90, %c0_91, %c0_92] : memref<3x1x32xf32, #tpu.memory_space<vmem>>, vector<1x1x32xf32>
    %111 = vector.shape_cast %110 : vector<1x1x32xf32> to vector<1x32xf32>
    %112 = vector.broadcast %111 : vector<1x32xf32> to vector<2x32xf32>
    %113 = arith.addf %109, %112 : vector<2x32xf32>
    %c2_93 = arith.constant 2 : index
    %c0_94 = arith.constant 0 : index
    %c0_95 = arith.constant 0 : index
    %114 = vector.load %arg12[%c2_93, %c0_94, %c0_95] : memref<3x32x32xf32, #tpu.memory_space<vmem>>, vector<1x32x32xf32>
    %115 = vector.shape_cast %114 : vector<1x32x32xf32> to vector<32x32xf32>
    %cst_96 = arith.constant dense<0.000000e+00> : vector<2x32xf32>
    %116 = tpu.matmul %70, %115, %cst_96 {dimension_numbers = #tpu.dot_dimension_numbers<[1], [0], [0], [1], [0, 0, 1, 1], [], []>} : vector<2x32xf32>, vector<32x32xf32>, vector<2x32xf32> -> vector<2x32xf32>
    %c2_97 = arith.constant 2 : index
    %c0_98 = arith.constant 0 : index
    %c0_99 = arith.constant 0 : index
    %117 = vector.load %arg14[%c2_97, %c0_98, %c0_99] : memref<3x1x32xf32, #tpu.memory_space<vmem>>, vector<1x1x32xf32>
    %118 = vector.shape_cast %117 : vector<1x1x32xf32> to vector<1x32xf32>
    %119 = vector.broadcast %118 : vector<1x32xf32> to vector<2x32xf32>
    %120 = arith.addf %116, %119 : vector<2x32xf32>
    %121 = arith.addf %85, %92 : vector<2x32xf32>
    %122 = arith.negf %121 : vector<2x32xf32>
    %123 = math.exp %122 : vector<2x32xf32>
    %cst_100 = arith.constant 1.000000e+00 : f32
    %124 = vector.broadcast %cst_100 : f32 to vector<2x32xf32>
    %125 = arith.addf %124, %123 : vector<2x32xf32>
    %126 = arith.divf %124, %125 : vector<2x32xf32>
    %127 = arith.addf %99, %106 : vector<2x32xf32>
    %128 = arith.negf %127 : vector<2x32xf32>
    %129 = math.exp %128 : vector<2x32xf32>
    %cst_101 = arith.constant 1.000000e+00 : f32
    %130 = vector.broadcast %cst_101 : f32 to vector<2x32xf32>
    %131 = arith.addf %130, %129 : vector<2x32xf32>
    %132 = arith.divf %130, %131 : vector<2x32xf32>
    %133 = arith.mulf %126, %120 : vector<2x32xf32>
    %134 = arith.addf %113, %133 : vector<2x32xf32>
    %135 = math.tanh %134 : vector<2x32xf32>
    %cst_102 = arith.constant 1.000000e+00 : f32
    %136 = vector.broadcast %cst_102 : f32 to vector<2x32xf32>
    %137 = arith.subf %136, %132 : vector<2x32xf32>
    %138 = arith.mulf %137, %135 : vector<2x32xf32>
    %139 = arith.mulf %132, %70 : vector<2x32xf32>
    %140 = arith.addf %138, %139 : vector<2x32xf32>
    %c0_103 = arith.constant 0 : index
    %c0_104 = arith.constant 0 : index
    %141 = vector.load %arg2[%c0_103, %c0_104] : memref<2x1xf32, #tpu.memory_space<vmem>>, vector<2x1xf32>
    %142 = vector.broadcast %141 : vector<2x1xf32> to vector<2x32xf32>
    %143 = arith.mulf %142, %140 : vector<2x32xf32>
    %cst_105 = arith.constant 1.000000e+00 : f32
    %144 = vector.broadcast %cst_105 : f32 to vector<2x1xf32>
    %145 = arith.subf %144, %141 : vector<2x1xf32>
    %146 = vector.broadcast %145 : vector<2x1xf32> to vector<2x32xf32>
    %147 = arith.mulf %146, %70 : vector<2x32xf32>
    %148 = arith.addf %143, %147 : vector<2x32xf32>
    %c0_106 = arith.constant 0 : index
    %c0_107 = arith.constant 0 : index
    %149 = vector.load %arg15[%c0_106, %c0_107] : memref<32x32xf32, #tpu.memory_space<vmem>>, vector<32x32xf32>
    %cst_108 = arith.constant dense<0.000000e+00> : vector<2x32xf32>
    %150 = tpu.matmul %148, %149, %cst_108 {dimension_numbers = #tpu.dot_dimension_numbers<[1], [0], [0], [1], [0, 0, 1, 1], [], []>} : vector<2x32xf32>, vector<32x32xf32>, vector<2x32xf32> -> vector<2x32xf32>
    %c0_109 = arith.constant 0 : index
    %c0_110 = arith.constant 0 : index
    %151 = vector.load %arg16[%c0_109, %c0_110] : memref<1x32xf32, #tpu.memory_space<vmem>>, vector<1x32xf32>
    %152 = vector.broadcast %151 : vector<1x32xf32> to vector<2x32xf32>
    %153 = arith.addf %150, %152 : vector<2x32xf32>
    %154 = arith.negf %153 : vector<2x32xf32>
    %155 = math.exp %154 : vector<2x32xf32>
    %cst_111 = arith.constant 1.000000e+00 : f32
    %156 = vector.broadcast %cst_111 : f32 to vector<2x32xf32>
    %157 = arith.addf %156, %155 : vector<2x32xf32>
    %158 = arith.divf %156, %157 : vector<2x32xf32>
    %c0_112 = arith.constant 0 : index
    %c0_113 = arith.constant 0 : index
    %159 = vector.load %arg17[%c0_112, %c0_113] : memref<32x256xf32, #tpu.memory_space<vmem>>, vector<32x256xf32>
    %cst_114 = arith.constant dense<0.000000e+00> : vector<2x256xf32>
    %160 = tpu.matmul %158, %159, %cst_114 {dimension_numbers = #tpu.dot_dimension_numbers<[1], [0], [0], [1], [0, 0, 1, 1], [], []>} : vector<2x32xf32>, vector<32x256xf32>, vector<2x256xf32> -> vector<2x256xf32>
    %c0_115 = arith.constant 0 : index
    %c0_116 = arith.constant 0 : index
    %161 = vector.load %arg18[%c0_115, %c0_116] : memref<1x256xf32, #tpu.memory_space<vmem>>, vector<1x256xf32>
    %162 = vector.broadcast %161 : vector<1x256xf32> to vector<2x256xf32>
    %163 = arith.addf %160, %162 : vector<2x256xf32>
    %cst_117 = arith.constant 0.000000e+00 : f32
    %164 = vector.broadcast %cst_117 : f32 to vector<2x256xf32>
    %165 = arith.maximumf %163, %164 : vector<2x256xf32>
    %c0_118 = arith.constant 0 : index
    %c0_119 = arith.constant 0 : index
    %166 = vector.load %arg19[%c0_118, %c0_119] : memref<256x768xf32, #tpu.memory_space<vmem>>, vector<256x768xf32>
    %cst_120 = arith.constant dense<0.000000e+00> : vector<2x768xf32>
    %167 = tpu.matmul %165, %166, %cst_120 {dimension_numbers = #tpu.dot_dimension_numbers<[1], [0], [0], [1], [0, 0, 1, 1], [], []>} : vector<2x256xf32>, vector<256x768xf32>, vector<2x768xf32> -> vector<2x768xf32>
    %c0_121 = arith.constant 0 : index
    %c0_122 = arith.constant 0 : index
    %168 = vector.load %arg20[%c0_121, %c0_122] : memref<1x768xf32, #tpu.memory_space<vmem>>, vector<1x768xf32>
    %169 = vector.broadcast %168 : vector<1x768xf32> to vector<2x768xf32>
    %170 = arith.addf %167, %169 : vector<2x768xf32>
    %171 = arith.negf %170 : vector<2x768xf32>
    %172 = math.exp %171 : vector<2x768xf32>
    %cst_123 = arith.constant 1.000000e+00 : f32
    %173 = vector.broadcast %cst_123 : f32 to vector<2x768xf32>
    %174 = arith.addf %173, %172 : vector<2x768xf32>
    %175 = arith.divf %173, %174 : vector<2x768xf32>
    %c0_124 = arith.constant 0 : index
    %c0_125 = arith.constant 0 : index
    %176 = vector.load %arg21[%c0_124, %c0_125] : memref<2x768xf32, #tpu.memory_space<vmem>>, vector<2x768xf32>
    tpu.vector_store %arg21[%c0_124, %c0_125], %175 {strides = array<i32>} : memref<2x768xf32, #tpu.memory_space<vmem>>, vector<2x768xf32>,
    %c0_126 = arith.constant 0 : index
    %c0_127 = arith.constant 0 : index
    %177 = vector.load %arg22[%c0_126, %c0_127] : memref<2x32xf32, #tpu.memory_space<vmem>>, vector<2x32xf32>
    tpu.vector_store %arg22[%c0_126, %c0_127], %158 {strides = array<i32>} : memref<2x32xf32, #tpu.memory_space<vmem>>, vector<2x32xf32>,
    return
  }
}

</mosaic_0001>

<bundles_post_ra>
// kernel: ae_predictor_step.3
= control target key start
LH: loop header
LB: loop body
LE: loop exit
PB: predicated region body
PF: predicated region fallthrough
CT: control target
= control target key end

     0   :  { %vm90_vm0 = vcmask 1042432   ;;  %vm41_vm1 = vcmask 220160   ;;  %vm255_vm2 = vcmask 130048   ;;  %s517_s1 = inlined_call_operand.vmem [shape: f32[27,16], index: 1, kind: input, shape index: {}]   ;;  %s518_s0 = inlined_call_operand.vmem [shape: f32[128,27], index: 0, kind: input, shape index: {}]   ;;  %s519_s2 = inlined_call_operand.vmem [shape: f32[1,16], index: 2, kind: input, shape index: {}]   ;;  %s520_s3 = inlined_call_operand.vmem [shape: f32[128,16], index: 3, kind: output, shape index: {}]  }
   0x1   :  { %v33_v0 = vld [vmem:[%s517_s1 + $0x18] sm:$0x7]  ;;  %v32_v1 = vld [vmem:[%s517_s1 + $0x10] sm:$0xff]  ;;  %v31_v2 = vld [vmem:[%s517_s1 + $0x8] sm:$0xff] }
   0x2   :  { %314 = vmatprep.subr.msk.mxu0 %vm90_vm0, %v33_v0  ;;  %346 = vmatprep.subr.msk.mxu1 %vm90_vm0, %v33_v0  ;;  %v30_v3 = vld [vmem:[%s517_s1] sm:$0xff]  ;;  %v15_v6 = vld [vmem:[%s518_s0 + $0x8] sm:$0xff]  ;;  %v16_v8 = vld [vmem:[%s518_s0 + $0x10] sm:$0xff] }
   0x3   :  { %315 = vmatpush3.msk.msra.mxu0 %vm90_vm0, %v33_v0  ;;  %350 = vmatpush3.msk.msra.mxu1 %vm90_vm0, %v33_v0  ;;  %v14_v4 = vld [vmem:[%s518_s0] sm:$0xff]  ;;  %v23_v7 = vld [vmem:[%s518_s0 + $0x48] sm:$0xff]  ;;  %v24_v9 = vld [vmem:[%s518_s0 + $0x50] sm:$0xff] }
   0x4   :  { %316 = vmatprep.subr.mxu0 %v32_v1  ;;  %347 = vmatprep.subr.mxu1 %v32_v1  ;;  %v22_v5 = vld [vmem:[%s518_s0 + $0x40] sm:$0xff]  ;;  %v17_v10 = vld [vmem:[%s518_s0 + $0x18] sm:$0xff]  ;;  %v19_v14 = vld [vmem:[%s518_s0 + $0x28] sm:$0xff] }
   0x5   :  { %317 = vmatpush3.msra.mxu0 %v32_v1  ;;  %351 = vmatpush3.msra.mxu1 %v32_v1  ;;  %v25_v11 = vld [vmem:[%s518_s0 + $0x58] sm:$0xff]  ;;  %v18_v12 = vld [vmem:[%s518_s0 + $0x20] sm:$0xff]  ;;  %v27_v15 = vld [vmem:[%s518_s0 + $0x68] sm:$0xff] }
   0x6   :  { %318 = vmatprep.subr.mxu0 %v31_v2  ;;  %348 = vmatprep.subr.mxu1 %v31_v2  ;;  %v26_v13 = vld [vmem:[%s518_s0 + $0x60] sm:$0xff]  ;;  %v20_v16 = vld [vmem:[%s518_s0 + $0x30] sm:$0xff]  ;;  %v21_v18 = vld [vmem:[%s518_s0 + $0x38] sm:$0xff] }
   0x7   :  { %319 = vmatpush3.msra.mxu0 %v31_v2  ;;  %352 = vmatpush3.msra.mxu1 %v31_v2  ;;  %v28_v17 = vld [vmem:[%s518_s0 + $0x70] sm:$0xff]  ;;  %v29_v19 = vld [vmem:[%s518_s0 + $0x78] sm:$0xff]  ;;  %v276_v20 = vld [vmem:[%s519_s2] ss:$0 sm:$0xff] }
   0x8   :  { %320 = vmatprep.subr.mxu0 %v30_v3  ;;  %349 = vmatprep.subr.mxu1 %v30_v3 }
   0x9   :  { %321 = vmatpush3.msra.mxu0 %v30_v3  ;;  %353 = vmatpush3.msra.mxu1 %v30_v3 }
   0xa   :  { %322 = vmatprep.mubr.msk.f32.mxu0 %vm41_vm1, %v14_v4  ;;  %334 = vmatprep.mubr.msk.f32.mxu1 %vm41_vm1, %v22_v5 }
   0xb   :  { %323 = vmatmul.mubr.msk.f32.vlgmr.msra.gmra.mxu0 %vm41_vm1, %v15_v6  ;;  %335 = vmatmul.mubr.msk.f32.vlgmr.msra.gmra.mxu1 %vm41_vm1, %v23_v7 }
   0xc   :  { %325 = vmatprep.mubr.msk.f32.mxu0 %vm41_vm1, %v16_v8  ;;  %337 = vmatprep.mubr.msk.f32.mxu1 %vm41_vm1, %v24_v9 }
   0xf   :  { %326 = vmatmul.mubr.msk.f32.gmra.mxu0 %vm41_vm1, %v17_v10  ;;  %338 = vmatmul.mubr.msk.f32.gmra.mxu1 %vm41_vm1, %v25_v11 }
  0x10   :  { %328 = vmatprep.mubr.msk.f32.mxu0 %vm41_vm1, %v18_v12  ;;  %340 = vmatprep.mubr.msk.f32.mxu1 %vm41_vm1, %v26_v13 }
  0x13   :  { %329 = vmatmul.mubr.msk.f32.gmra.mxu0 %vm41_vm1, %v19_v14  ;;  %341 = vmatmul.mubr.msk.f32.gmra.mxu1 %vm41_vm1, %v27_v15 }
  0x14   :  { %331 = vmatprep.mubr.msk.f32.mxu0 %vm41_vm1, %v20_v16  ;;  %343 = vmatprep.mubr.msk.f32.mxu1 %vm41_vm1, %v28_v17 }
  0x17   :  { %332 = vmatmul.mubr.msk.f32.gmra.mxu0 %vm41_vm1, %v21_v18  ;;  %344 = vmatmul.mubr.msk.f32.gmra.mxu1 %vm41_vm1, %v29_v19 }
  0xcb   :  { %v324_v21 = vpop.f32.mrf.mxu0  ;;  %v336_v22 = vpop.f32.mrf.mxu1 }
  0xcc   :  { %v166_v23 = vadd.f32 %v324_v21, %v276_v20  ;;  %v206_v24 = vadd.f32 %v336_v22, %v276_v20 }
  0xcd   :  { %v160_v25 = vpop.f32.mrf.mxu0  ;;  %v200_v26 = vpop.f32.mrf.mxu1 }
  0xce   :  { %v240_v27 = vmax.f32 %v166_v23, 0.0  ;;  %v248_v28 = vmax.f32 %v206_v24, 0.0  ;;  %v161_v29 = vadd.f32 %v276_v20, %v160_v25  ;;  %v201_v30 = vadd.f32 %v276_v20, %v200_v26 }
  0xcf   :  { %v327_v31 = vpop.f32.mrf.mxu0  ;;  %v339_v32 = vpop.f32.mrf.mxu1 }
  0xd0   :  { %257 = vst.msk [vmem:[%s520_s3 + $0x8] sm:$0xff] %vm255_vm2, %v240_v27  ;;  %265 = vst.msk [vmem:[%s520_s3 + $0x48] sm:$0xff] %vm255_vm2, %v248_v28  ;;  %v239_v33 = vmax.f32 %v161_v29, 0.0  ;;  %v247_v34 = vmax.f32 %v201_v30, 0.0  ;;  %v176_v35 = vadd.f32 %v327_v31, %v276_v20  ;;  %v216_v36 = vadd.f32 %v339_v32, %v276_v20 }
  0xd1   :  { %v170_v37 = vpop.f32.mrf.mxu0  ;;  %v210_v38 = vpop.f32.mrf.mxu1 }
  0xd2   :  { %256 = vst.msk [vmem:[%s520_s3] sm:$0xff] %vm255_vm2, %v239_v33  ;;  %264 = vst.msk [vmem:[%s520_s3 + $0x40] sm:$0xff] %vm255_vm2, %v247_v34  ;;  %v242_v39 = vmax.f32 %v176_v35, 0.0  ;;  %v250_v40 = vmax.f32 %v216_v36, 0.0  ;;  %v171_v41 = vadd.f32 %v276_v20, %v170_v37  ;;  %v211_v42 = vadd.f32 %v276_v20, %v210_v38 }
  0xd3   :  { %v330_v43 = vpop.f32.mrf.mxu0  ;;  %v342_v44 = vpop.f32.mrf.mxu1 }
  0xd4   :  { %259 = vst.msk [vmem:[%s520_s3 + $0x18] sm:$0xff] %vm255_vm2, %v242_v39  ;;  %267 = vst.msk [vmem:[%s520_s3 + $0x58] sm:$0xff] %vm255_vm2, %v250_v40  ;;  %v241_v45 = vmax.f32 %v171_v41, 0.0  ;;  %v249_v46 = vmax.f32 %v211_v42, 0.0  ;;  %v186_v47 = vadd.f32 %v330_v43, %v276_v20  ;;  %v226_v48 = vadd.f32 %v342_v44, %v276_v20 }
  0xd5   :  { %v180_v49 = vpop.f32.mrf.mxu0  ;;  %v220_v50 = vpop.f32.mrf.mxu1 }
  0xd6   :  { %258 = vst.msk [vmem:[%s520_s3 + $0x10] sm:$0xff] %vm255_vm2, %v241_v45  ;;  %266 = vst.msk [vmem:[%s520_s3 + $0x50] sm:$0xff] %vm255_vm2, %v249_v46  ;;  %v244_v51 = vmax.f32 %v186_v47, 0.0  ;;  %v252_v52 = vmax.f32 %v226_v48, 0.0  ;;  %v181_v53 = vadd.f32 %v276_v20, %v180_v49  ;;  %v221_v54 = vadd.f32 %v276_v20, %v220_v50 }
  0xd7   :  { %v333_v55 = vpop.f32.mrf.mxu0  ;;  %v345_v56 = vpop.f32.mrf.mxu1 }
  0xd8   :  { %261 = vst.msk [vmem:[%s520_s3 + $0x28] sm:$0xff] %vm255_vm2, %v244_v51  ;;  %269 = vst.msk [vmem:[%s520_s3 + $0x68] sm:$0xff] %vm255_vm2, %v252_v52  ;;  %v243_v57 = vmax.f32 %v181_v53, 0.0  ;;  %v251_v58 = vmax.f32 %v221_v54, 0.0  ;;  %v196_v59 = vadd.f32 %v333_v55, %v276_v20  ;;  %v236_v60 = vadd.f32 %v345_v56, %v276_v20 }
  0xd9   :  { %v190_v61 = vpop.f32.mrf.mxu0  ;;  %v230_v62 = vpop.f32.mrf.mxu1 }
  0xda   :  { %260 = vst.msk [vmem:[%s520_s3 + $0x20] sm:$0xff] %vm255_vm2, %v243_v57  ;;  %268 = vst.msk [vmem:[%s520_s3 + $0x60] sm:$0xff] %vm255_vm2, %v251_v58  ;;  %v246_v63 = vmax.f32 %v196_v59, 0.0  ;;  %v254_v0 = vmax.f32 %v236_v60, 0.0  ;;  %v191_v1 = vadd.f32 %v276_v20, %v190_v61  ;;  %v231_v2 = vadd.f32 %v276_v20, %v230_v62 }
  0xdc   :  { %263 = vst.msk [vmem:[%s520_s3 + $0x38] sm:$0xff] %vm255_vm2, %v246_v63  ;;  %271 = vst.msk [vmem:[%s520_s3 + $0x78] sm:$0xff] %vm255_vm2, %v254_v0  ;;  %v245_v3 = vmax.f32 %v191_v1, 0.0  ;;  %v253_v4 = vmax.f32 %v231_v2, 0.0 }
  0xde   :  { %262 = vst.msk [vmem:[%s520_s3 + $0x30] sm:$0xff] %vm255_vm2, %v245_v3  ;;  %270 = vst.msk [vmem:[%s520_s3 + $0x70] sm:$0xff] %vm255_vm2, %v253_v4 }

// kernel: ae_predictor_step.4
= control target key start
LH: loop header
LB: loop body
LE: loop exit
PB: predicated region body
PF: predicated region fallthrough
CT: control target
= control target key end

     0   :  { %v200_v0 = vmov 0.0   ;;  %vm47_vm0 = vcmask 130048   ;;  %vm149_vm1 = vcmask 261120   ;;  %s354_s1 = inlined_call_operand.vmem [shape: f32[144,32], index: 1, kind: input, shape index: {}]   ;;  %s355_s0 = inlined_call_operand.vmem [shape: f32[32,144], index: 0, kind: input, shape index: {}]   ;;  %s356_s2 = inlined_call_operand.vmem [shape: f32[1,32], index: 2, kind: input, shape index: {}]   ;;  %s357_s3 = inlined_call_operand.vmem [shape: f32[32,32], index: 3, kind: output, shape index: {}]  }
   0x1   :  { %60 = vmatprep.subr.mxu0 %v200_v0  ;;  %163 = vmatprep.subr.mxu1 %v200_v0  ;;  %v37_v1 = vld [vmem:[%s354_s1 + $0x78] sm:$0xff]  ;;  %v36_v2 = vld [vmem:[%s354_s1 + $0x70] sm:$0xff]  ;;  %v35_v3 = vld [vmem:[%s354_s1 + $0x68] sm:$0xff] }
   0x2   :  { %61 = vmatpush1.msra.mxu0 %v37_v1  ;;  %181 = vmatpush1.msra.mxu1 %v37_v1  ;;  %v34_v4 = vld [vmem:[%s354_s1 + $0x60] sm:$0xff]  ;;  %v33_v5 = vld [vmem:[%s354_s1 + $0x58] sm:$0xff]  ;;  %v32_v6 = vld [vmem:[%s354_s1 + $0x50] sm:$0xff] }
   0x3   :  { %62 = vmatprep.subr.mxu0 %v200_v0  ;;  %164 = vmatprep.subr.mxu1 %v200_v0  ;;  %v31_v7 = vld [vmem:[%s354_s1 + $0x48] sm:$0xff]  ;;  %v30_v8 = vld [vmem:[%s354_s1 + $0x40] sm:$0xff]  ;;  %v29_v9 = vld [vmem:[%s354_s1 + $0x38] sm:$0xff] }
   0x4   :  { %63 = vmatpush1.msra.mxu0 %v36_v2  ;;  %182 = vmatpush1.msra.mxu1 %v36_v2  ;;  %v28_v10 = vld [vmem:[%s354_s1 + $0x30] sm:$0xff]  ;;  %v27_v11 = vld [vmem:[%s354_s1 + $0x28] sm:$0xff]  ;;  %v26_v12 = vld [vmem:[%s354_s1 + $0x20] sm:$0xff] }
   0x5   :  { %64 = vmatprep.subr.mxu0 %v200_v0  ;;  %165 = vmatprep.subr.mxu1 %v200_v0  ;;  %v25_v13 = vld [vmem:[%s354_s1 + $0x18] sm:$0xff]  ;;  %v24_v14 = vld [vmem:[%s354_s1 + $0x10] sm:$0xff]  ;;  %v23_v15 = vld [vmem:[%s354_s1 + $0x8] sm:$0xff] }
   0x6   :  { %65 = vmatpush1.msra.mxu0 %v35_v3  ;;  %183 = vmatpush1.msra.mxu1 %v35_v3  ;;  %v22_v16 = vld [vmem:[%s354_s1] sm:$0xff]  ;;  %v39_v17 = vld [vmem:[%s354_s1 + $0x88] sm:$0xff]  ;;  %v17_v23 = vld [vmem:[%s355_s0 + $0x18] sm:$0xff] }
   0x7   :  { %66 = vmatprep.subr.mxu0 %v200_v0  ;;  %166 = vmatprep.subr.mxu1 %v200_v0  ;;  %v38_v18 = vld [vmem:[%s354_s1 + $0x80] sm:$0xff]  ;;  %v15_v19 = vld [vmem:[%s355_s0 + $0x8] sm:$0xff]  ;;  %v21_v24 = vld [vmem:[%s355_s0 + $0x38] sm:$0xff] }
   0x8   :  { %67 = vmatpush1.msra.mxu0 %v34_v4  ;;  %184 = vmatpush1.msra.mxu1 %v34_v4  ;;  %v19_v20 = vld [vmem:[%s355_s0 + $0x28] sm:$0xff]  ;;  %v14_v21 = vld [vmem:[%s355_s0] sm:$0xff]  ;;  %v16_v25 = vld [vmem:[%s355_s0 + $0x10] sm:$0xff] }
   0x9   :  { %68 = vmatprep.subr.mxu0 %v200_v0  ;;  %167 = vmatprep.subr.mxu1 %v200_v0  ;;  %v18_v22 = vld [vmem:[%s355_s0 + $0x20] sm:$0xff]  ;;  %v20_v26 = vld [vmem:[%s355_s0 + $0x30] sm:$0xff] }
   0xa   :  { %69 = vmatpush1.msra.mxu0 %v33_v5  ;;  %185 = vmatpush1.msra.mxu1 %v33_v5  ;;  %v158_v27 = vld [vmem:[%s356_s2] ss:$0 sm:$0xff] }
   0xb   :  { %70 = vmatprep.subr.mxu0 %v200_v0  ;;  %168 = vmatprep.subr.mxu1 %v200_v0 }
   0xc   :  { %71 = vmatpush1.msra.mxu0 %v32_v6  ;;  %186 = vmatpush1.msra.mxu1 %v32_v6 }
   0xd   :  { %72 = vmatprep.subr.mxu0 %v200_v0  ;;  %169 = vmatprep.subr.mxu1 %v200_v0 }
   0xe   :  { %73 = vmatpush1.msra.mxu0 %v31_v7  ;;  %187 = vmatpush1.msra.mxu1 %v31_v7 }
   0xf   :  { %74 = vmatprep.subr.mxu0 %v200_v0  ;;  %170 = vmatprep.subr.mxu1 %v200_v0 }
  0x10   :  { %75 = vmatpush1.msra.mxu0 %v30_v8  ;;  %188 = vmatpush1.msra.mxu1 %v30_v8 }
  0x11   :  { %76 = vmatprep.subr.mxu0 %v200_v0  ;;  %171 = vmatprep.subr.mxu1 %v200_v0 }
  0x12   :  { %77 = vmatpush1.msra.mxu0 %v29_v9  ;;  %189 = vmatpush1.msra.mxu1 %v29_v9 }
  0x13   :  { %78 = vmatprep.subr.mxu0 %v200_v0  ;;  %172 = vmatprep.subr.mxu1 %v200_v0 }
  0x14   :  { %79 = vmatpush1.msra.mxu0 %v28_v10  ;;  %190 = vmatpush1.msra.mxu1 %v28_v10 }
  0x15   :  { %80 = vmatprep.subr.mxu0 %v200_v0  ;;  %173 = vmatprep.subr.mxu1 %v200_v0 }
  0x16   :  { %81 = vmatpush1.msra.mxu0 %v27_v11  ;;  %191 = vmatpush1.msra.mxu1 %v27_v11 }
  0x17   :  { %82 = vmatprep.subr.mxu0 %v200_v0  ;;  %174 = vmatprep.subr.mxu1 %v200_v0 }
  0x18   :  { %83 = vmatpush1.msra.mxu0 %v26_v12  ;;  %192 = vmatpush1.msra.mxu1 %v26_v12 }
  0x19   :  { %84 = vmatprep.subr.mxu0 %v200_v0  ;;  %175 = vmatprep.subr.mxu1 %v200_v0 }
  0x1a   :  { %85 = vmatpush1.msra.mxu0 %v25_v13  ;;  %193 = vmatpush1.msra.mxu1 %v25_v13 }
  0x1b   :  { %86 = vmatprep.subr.mxu0 %v200_v0  ;;  %176 = vmatprep.subr.mxu1 %v200_v0 }
  0x1c   :  { %87 = vmatpush1.msra.mxu0 %v24_v14  ;;  %194 = vmatpush1.msra.mxu1 %v24_v14 }
  0x1d   :  { %88 = vmatprep.subr.mxu0 %v200_v0  ;;  %177 = vmatprep.subr.mxu1 %v200_v0 }
  0x1e   :  { %89 = vmatpush1.msra.mxu0 %v23_v15  ;;  %195 = vmatpush1.msra.mxu1 %v23_v15 }
  0x1f   :  { %90 = vmatprep.subr.mxu0 %v200_v0  ;;  %178 = vmatprep.subr.mxu1 %v200_v0 }
  0x20   :  { %91 = vmatpush1.msra.mxu0 %v22_v16  ;;  %196 = vmatpush1.msra.mxu1 %v22_v16 }
  0x21   :  { %120 = vmatprep.subr.mxu0 %v200_v0  ;;  %179 = vmatprep.subr.mxu1 %v200_v0 }
  0x22   :  { %121 = vmatpush2.msra.mxu0 %v39_v17  ;;  %197 = vmatpush2.msra.mxu1 %v39_v17 }
  0x23   :  { %122 = vmatprep.subr.mxu0 %v200_v0  ;;  %180 = vmatprep.subr.mxu1 %v200_v0 }
  0x24   :  { %123 = vmatpush2.msra.mxu0 %v38_v18  ;;  %198 = vmatpush2.msra.mxu1 %v38_v18 }
  0x25   :  { %159 = vmatprep.mubr.msk.f32.mxu0 %vm47_vm0, %v15_v19  ;;  %161 = vmatprep.mubr.msk.f32.mxu1 %vm47_vm0, %v19_v20 }
  0x26   :  { %125 = vmatmul.mubr.f32.vlgmr.msra.gmra.mxu0 %v14_v21  ;;  %135 = vmatmul.mubr.f32.vlgmr.msra.gmra.mxu1 %v18_v22 }
  0x27   :  { %160 = vmatprep.mubr.msk.f32.mxu0 %vm47_vm0, %v17_v23  ;;  %162 = vmatprep.mubr.msk.f32.mxu1 %vm47_vm0, %v21_v24 }
  0x2a   :  { %130 = vmatmul.mubr.f32.gmra.mxu0 %v16_v25  ;;  %140 = vmatmul.mubr.f32.gmra.mxu1 %v20_v26 }
  0xe6   :  { %v126_v28 = vpop.f32.mrf.mxu0  ;;  %v136_v29 = vpop.f32.mrf.mxu1 }
  0xe7   :  { %v127_v30 = vadd.f32 %v158_v27, %v126_v28  ;;  %v137_v31 = vadd.f32 %v158_v27, %v136_v29 }
  0xe8   :  { %v128_v32 = vpop.f32.mrf.mxu0  ;;  %v138_v33 = vpop.f32.mrf.mxu1 }
  0xe9   :  { %v145_v34 = vmax.f32 %v127_v30, 0.0  ;;  %v147_v35 = vmax.f32 %v137_v31, 0.0 }
  0xea   :  { %v131_v36 = vpop.f32.mrf.mxu0  ;;  %v141_v37 = vpop.f32.mrf.mxu1 }
  0xeb   :  { %150 = vst.msk [vmem:[%s357_s3] sm:$0xff] %vm149_vm1, %v145_v34  ;;  %152 = vst.msk [vmem:[%s357_s3 + $0x10] sm:$0xff] %vm149_vm1, %v147_v35  ;;  %v132_v38 = vadd.f32 %v158_v27, %v131_v36  ;;  %v142_v39 = vadd.f32 %v158_v27, %v141_v37 }
  0xec   :  { %v133_v40 = vpop.f32.mrf.mxu0  ;;  %v143_v41 = vpop.f32.mrf.mxu1 }
  0xed   :  { %v146_v42 = vmax.f32 %v132_v38, 0.0  ;;  %v148_v43 = vmax.f32 %v142_v39, 0.0 }
  0xef   :  { %151 = vst.msk [vmem:[%s357_s3 + $0x8] sm:$0xff] %vm149_vm1, %v146_v42  ;;  %153 = vst.msk [vmem:[%s357_s3 + $0x18] sm:$0xff] %vm149_vm1, %v148_v43 }

// kernel: ae_predictor_step.5
= control target key start
LH: loop header
LB: loop body
LE: loop exit
PB: predicated region body
PF: predicated region fallthrough
CT: control target
= control target key end

     0   :  { %s3887_s0 = inlined_call_operand.vmem [shape: f32[2,512], index: 0, kind: input, shape index: {}]   ;;  %s3888_s1 = inlined_call_operand.vmem [shape: f32[2,6], index: 1, kind: input, shape index: {}]   ;;  %s3889_s2 = inlined_call_operand.vmem [shape: f32[2,1], index: 2, kind: input, shape index: {}]   ;;  %s3890_s3 = inlined_call_operand.vmem [shape: f32[512,32], index: 3, kind: input, shape index: {}]   ;;  %s3891_s4 = inlined_call_operand.vmem [shape: f32[1,32], index: 4, kind: input, shape index: {}]   ;;  %s3892_s5 = inlined_call_operand.vmem [shape: f32[3,32,32], index: 5, kind: input, shape index: {}]   ;;  %s3893_s6 = inlined_call_operand.vmem [shape: f32[3,32,32], index: 6, kind: input, shape index: {}]   ;;  %s3894_s7 = inlined_call_operand.vmem [shape: f32[3,1,32], index: 7, kind: input, shape index: {}]   ;;  %s3895_s8 = inlined_call_operand.vmem [shape: f32[3,1,32], index: 8, kind: input, shape index: {}]   ;;  %s3896_s9 = inlined_call_operand.vmem [shape: f32[6,32], index: 9, kind: input, shape index: {}]   ;;  %s3897_s10 = inlined_call_operand.vmem [shape: f32[1,32], index: 10, kind: input, shape index: {}]   ;;  %s3898_s11 = inlined_call_operand.vmem [shape: f32[3,32,32], index: 11, kind: input, shape index: {}]   ;;  %s3899_s12 = inlined_call_operand.vmem [shape: f32[3,32,32], index: 12, kind: input, shape index: {}]   ;;  %s3900_s13 = inlined_call_operand.vmem [shape: f32[3,1,32], index: 13, kind: input, shape index: {}]   ;;  %s3901_s14 = inlined_call_operand.vmem [shape: f32[3,1,32], index: 14, kind: input, shape index: {}]   ;;  %s3902_s15 = inlined_call_operand.vmem [shape: f32[32,32], index: 15, kind: input, shape index: {}]   ;;  %s3903_s16 = inlined_call_operand.vmem [shape: f32[1,32], index: 16, kind: input, shape index: {}]   ;;  %s3904_s17 = inlined_call_operand.vmem [shape: f32[32,256], index: 17, kind: input, shape index: {}]   ;;  %s3905_s18 = inlined_call_operand.vmem [shape: f32[1,256], index: 18, kind: input, shape index: {}]   ;;  %s3906_s19 = inlined_call_operand.vmem [shape: f32[256,768], index: 19, kind: input, shape index: {}]   ;;  %s3907_s20 = inlined_call_operand.vmem [shape: f32[1,768], index: 20, kind: input, shape index: {}]   ;;  %s3908_s21 = inlined_call_operand.vmem [shape: f32[2,768], index: 21, kind: output, shape index: {0}]   ;;  %s3909_s22 = inlined_call_operand.hbm [shape: f32[2,32], index: 22, kind: output, shape index: {1}]  }
   0x1   :  { %3913 = sst [smem:[#allocation5_spill]] %s3887_s0 }
   0x2   :  { %3914 = sst [smem:[#allocation6_spill]] %s3888_s1 }
   0x3   :  { %3915 = sst [smem:[#allocation7_spill]] %s3889_s2 }
   0x4   :  { %3916 = sst [smem:[#allocation8_spill]] %s3890_s3 }
   0x5   :  { %3917 = sst [smem:[#allocation9_spill]] %s3891_s4 }
   0x6   :  { %3918 = sst [smem:[#allocation10_spill]] %s3892_s5 }
   0x7   :  { %3919 = sst [smem:[#allocation11_spill]] %s3893_s6 }
   0x8   :  { %s3920_s29 = sld [smem:[#allocation8_spill]]  ;;  %v148_v3 = vlaneseq  ;;  %v2608_v5 = vmov 1983009808  }
   0x9   :  { %v146_v6 = vunpack.c.l.s4 %v2608_v5  ;;  %s3921_s3 = sld [smem:[#allocation5_spill]] }
   0xa   :  { %v2746_v10 = vshrl.u32 %v148_v3, 7 }
   0xb   :  { %v147_v9 = vunpack.c.0.s8 %v146_v6 }
   0xd   :  { %v2761_v15 = vsub.s32 %v147_v9, %v2746_v10 }
   0xe   :  { %v103_v0 = vld [vmem:[%s3920_s29 + $0xf8] sm:$0xff]  ;;  %v102_v2 = vld [vmem:[%s3920_s29 + $0xf0] sm:$0xff]  ;;  %v101_v7 = vld [vmem:[%s3920_s29 + $0xe8] sm:$0xff] }
   0xf   :  { %v87_v1 = vld [vmem:[%s3920_s29 + $0x78] sm:$0xff]  ;;  %2246 = vmatprep.subr.mxu0 %v103_v0  ;;  %v86_v4 = vld [vmem:[%s3920_s29 + $0x70] sm:$0xff]  ;;  %v85_v8 = vld [vmem:[%s3920_s29 + $0x68] sm:$0xff] }
  0x10   :  { %2247 = vmatpush3.msra.mxu0 %v87_v1  ;;  %v100_v11 = vld [vmem:[%s3920_s29 + $0xe0] sm:$0xff]  ;;  %v99_v13 = vld [vmem:[%s3920_s29 + $0xd8] sm:$0xff]  ;;  %v98_v16 = vld [vmem:[%s3920_s29 + $0xd0] sm:$0xff] }
  0x11   :  { %2248 = vmatprep.subr.mxu0 %v102_v2  ;;  %v84_v12 = vld [vmem:[%s3920_s29 + $0x60] sm:$0xff]  ;;  %v83_v14 = vld [vmem:[%s3920_s29 + $0x58] sm:$0xff]  ;;  %v82_v17 = vld [vmem:[%s3920_s29 + $0x50] sm:$0xff] }
  0x12   :  { %2249 = vmatpush3.msra.mxu0 %v86_v4  ;;  %v97_v18 = vld [vmem:[%s3920_s29 + $0xc8] sm:$0xff]  ;;  %v71_v19 = vld [vmem:[%s3921_s3] sm:$0xff]  ;;  %v95_v25 = vld [vmem:[%s3920_s29 + $0xb8] sm:$0xff] }
  0x13   :  { %2250 = vmatprep.subr.mxu0 %v101_v7  ;;  %v81_v20 = vld [vmem:[%s3920_s29 + $0x48] sm:$0xff]  ;;  %v151_v21 = vrot.slane %v71_v19, %v2761_v15  ;;  %v96_v22 = vld [vmem:[%s3920_s29 + $0xc0] sm:$0xff]  ;;  %v79_v26 = vld [vmem:[%s3920_s29 + $0x38] sm:$0xff] }
  0x14   :  { %2251 = vmatpush3.msra.mxu0 %v85_v8  ;;  %v80_v23 = vld [vmem:[%s3920_s29 + $0x40] sm:$0xff]  ;;  %v94_v27 = vld [vmem:[%s3920_s29 + $0xb0] sm:$0xff]  ;;  %v93_v29 = vld [vmem:[%s3920_s29 + $0xa8] sm:$0xff] }
  0x15   :  { %2252 = vmatprep.subr.mxu0 %v100_v11  ;;  %v159_v24 = vcombine.high %v151_v21, %v151_v21  ;;  %v78_v28 = vld [vmem:[%s3920_s29 + $0x30] sm:$0xff]  ;;  %v77_v30 = vld [vmem:[%s3920_s29 + $0x28] sm:$0xff]  ;;  %v92_v31 = vld [vmem:[%s3920_s29 + $0xa0] sm:$0xff] }
  0x16   :  { %2253 = vmatpush3.msra.mxu0 %v84_v12  ;;  %v76_v32 = vld [vmem:[%s3920_s29 + $0x20] sm:$0xff] }
  0x17   :  { %2254 = vmatprep.subr.mxu0 %v99_v13  ;;  %229 = vmatprep.mubr.f32.mxu0 %v159_v24 }
  0x18   :  { %2255 = vmatpush3.msra.mxu0 %v83_v14 }
  0x19   :  { %2256 = vmatprep.subr.mxu0 %v98_v16 }
  0x1a   :  { %2257 = vmatpush3.msra.mxu0 %v82_v17 }
  0x1b   :  { %2258 = vmatprep.subr.mxu0 %v97_v18 }
  0x1c   :  { %2259 = vmatpush3.msra.mxu0 %v81_v20 }
  0x1d   :  { %2260 = vmatprep.subr.mxu0 %v96_v22 }
  0x1e   :  { %2261 = vmatpush3.msra.mxu0 %v80_v23 }
  0x1f   :  { %2262 = vmatprep.subr.mxu0 %v95_v25 }
  0x20   :  { %2263 = vmatpush3.msra.mxu0 %v79_v26 }
  0x21   :  { %2264 = vmatprep.subr.mxu0 %v94_v27 }
  0x22   :  { %2265 = vmatpush3.msra.mxu0 %v78_v28 }
  0x23   :  { %2266 = vmatprep.subr.mxu0 %v93_v29 }
  0x24   :  { %28 = vsyncpa [#allocation3], 0  ;;  %2267 = vmatpush3.msra.mxu0 %v77_v30  ;;  %v91_v33 = vld [vmem:[%s3920_s29 + $0x98] sm:$0xff]  ;;  %v144_v34 = vcombine.high %v71_v19, %v71_v19  ;;  %v90_v36 = vld [vmem:[%s3920_s29 + $0x90] sm:$0xff]  ;;  %v2609_v13 = vmov 0.0   ;;  %s3922_s5 = sld [smem:[#allocation11_spill]] }
  0x25   :  { %2268 = vmatprep.subr.mxu0 %v92_v31  ;;  %v75_v35 = vld [vmem:[%s3920_s29 + $0x18] sm:$0xff]  ;;  %v74_v37 = vld [vmem:[%s3920_s29 + $0x10] sm:$0xff]  ;;  %v89_v38 = vld [vmem:[%s3920_s29 + $0x88] sm:$0xff]  ;;  %2394 = vmatprep.subr.mxu1 %v2609_v13  ;;  %s3923_s25 = sld [smem:[#allocation10_spill]]  ;;  %vm2610_vm0 = vmmov 0   ;;  %vm317_vm1 = vcmask 261120  }
  0x26   :  { %2269 = vmatpush3.msra.mxu0 %v76_v32  ;;  %v2825_v39 = vrot.slane %v144_v34, %v2761_v15  ;;  %v73_v40 = vld [vmem:[%s3920_s29 + $0x8] sm:$0xff]  ;;  %v88_v41 = vld [vmem:[%s3920_s29 + $0x80] sm:$0xff]  ;;  %v135_v43 = vld [vmem:[%s3920_s29 + $0x1f8] sm:$0xff]  ;;  %2402 = vmatprep.mubr.msk.f32.mxu1 %vm2610_vm0, %v2609_v13  ;;  %s3924_s3 = sld [smem:[#allocation7_spill]]  ;;  %v2611_v32 = vmov 0   ;;  %vm841_vm2 = vcmask 1045504  }
  0x27   :  { %2270 = vmatprep.subr.mxu0 %v91_v33  ;;  %v72_v42 = vld [vmem:[%s3920_s29] sm:$0xff]  ;;  %v119_v45 = vld [vmem:[%s3920_s29 + $0x178] sm:$0xff]  ;;  %v134_v46 = vld [vmem:[%s3920_s29 + $0x1f0] sm:$0xff]  ;;  %2536 = vset.pattern.permute.xlu0 %v2611_v32  ;;  %s3925_s30 = sld [smem:[#allocation9_spill]]  ;;  %vm837_vm3 = vcmask 48128   ;;  %vm2146_vm4 = vcmask 254976  }
  0x28   :  { %2271 = vmatpush3.msra.mxu0 %v75_v35  ;;  %v160_v44 = vcombine.high %v2825_v39, %v2825_v39  ;;  %v118_v47 = vld [vmem:[%s3920_s29 + $0x170] sm:$0xff]  ;;  %v133_v48 = vld [vmem:[%s3920_s29 + $0x1e8] sm:$0xff]  ;;  %v132_v50 = vld [vmem:[%s3920_s29 + $0x1e0] sm:$0xff] }
  0x29   :  { %2272 = vmatprep.subr.mxu0 %v90_v36  ;;  %v117_v49 = vld [vmem:[%s3920_s29 + $0x168] sm:$0xff]  ;;  %v116_v51 = vld [vmem:[%s3920_s29 + $0x160] sm:$0xff]  ;;  %v131_v52 = vld [vmem:[%s3920_s29 + $0x1d8] sm:$0xff] }
  0x2a   :  { %2273 = vmatpush3.msra.mxu0 %v74_v37  ;;  %v115_v53 = vld [vmem:[%s3920_s29 + $0x158] sm:$0xff]  ;;  %v130_v54 = vld [vmem:[%s3920_s29 + $0x1d0] sm:$0xff]  ;;  %v129_v56 = vld [vmem:[%s3920_s29 + $0x1c8] sm:$0xff] }
  0x2b   :  { %2274 = vmatprep.subr.mxu0 %v89_v38  ;;  %v114_v55 = vld [vmem:[%s3920_s29 + $0x150] sm:$0xff]  ;;  %v113_v57 = vld [vmem:[%s3920_s29 + $0x148] sm:$0xff]  ;;  %v128_v58 = vld [vmem:[%s3920_s29 + $0x1c0] sm:$0xff] }
  0x2c   :  { %2275 = vmatpush3.msra.mxu0 %v73_v40  ;;  %v112_v59 = vld [vmem:[%s3920_s29 + $0x140] sm:$0xff]  ;;  %v127_v60 = vld [vmem:[%s3920_s29 + $0x1b8] sm:$0xff]  ;;  %v126_v62 = vld [vmem:[%s3920_s29 + $0x1b0] sm:$0xff] }
  0x2d   :  { %2276 = vmatprep.subr.mxu0 %v88_v41  ;;  %v111_v61 = vld [vmem:[%s3920_s29 + $0x138] sm:$0xff]  ;;  %v110_v63 = vld [vmem:[%s3920_s29 + $0x130] sm:$0xff]  ;;  %v125_v0 = vld [vmem:[%s3920_s29 + $0x1a8] sm:$0xff] }
  0x2e   :  { %2277 = vmatpush3.msra.mxu0 %v72_v42  ;;  %v109_v1 = vld [vmem:[%s3920_s29 + $0x128] sm:$0xff]  ;;  %v124_v2 = vld [vmem:[%s3920_s29 + $0x1a0] sm:$0xff]  ;;  %v123_v4 = vld [vmem:[%s3920_s29 + $0x198] sm:$0xff] }
  0x2f   :  { %230 = vmatmul.mubr.f32.vlgmr.msra.gmra.mxu0 %v151_v21  ;;  %2281 = vmatprep.subr.mxu0 %v135_v43  ;;  %v108_v3 = vld [vmem:[%s3920_s29 + $0x120] sm:$0xff]  ;;  %v107_v5 = vld [vmem:[%s3920_s29 + $0x118] sm:$0xff]  ;;  %v122_v6 = vld [vmem:[%s3920_s29 + $0x190] sm:$0xff] }
  0x30   :  { %2282 = vmatpush3.msra.mxu0 %v119_v45  ;;  %299 = vmatprep.mubr.f32.mxu0 %v160_v44  ;;  %v106_v7 = vld [vmem:[%s3920_s29 + $0x110] sm:$0xff]  ;;  %v121_v8 = vld [vmem:[%s3920_s29 + $0x188] sm:$0xff]  ;;  %v120_v11 = vld [vmem:[%s3920_s29 + $0x180] sm:$0xff] }
  0x31   :  { %2283 = vmatprep.subr.mxu0 %v134_v46  ;;  %v105_v9 = vld [vmem:[%s3920_s29 + $0x108] sm:$0xff]  ;;  %v104_v12 = vld [vmem:[%s3920_s29 + $0x100] sm:$0xff]  ;;  %v394_v14 = vld [vmem:[%s3922_s5 + $0x18] sm:$0xff] }
  0x32   :  { %2284 = vmatpush3.msra.mxu0 %v118_v47  ;;  %2395 = vmatpush3.msra.mxu1 %v394_v14  ;;  %v309_v16 = vld [vmem:[%s3923_s25 + $0x18] sm:$0xff]  ;;  %v393_v17 = vld [vmem:[%s3922_s5 + $0x10] sm:$0xff]  ;;  %v392_v19 = vld [vmem:[%s3922_s5 + $0x8] sm:$0xff] }
  0x33   :  { %2285 = vmatprep.subr.mxu0 %v133_v48  ;;  %2396 = vmatprep.subr.mxu1 %v2609_v13  ;;  %v308_v18 = vld [vmem:[%s3923_s25 + $0x10] sm:$0xff]  ;;  %v307_v20 = vld [vmem:[%s3923_s25 + $0x8] sm:$0xff]  ;;  %v391_v21 = vld [vmem:[%s3922_s5] sm:$0xff] }
  0x34   :  { %2286 = vmatpush3.msra.mxu0 %v117_v49  ;;  %2397 = vmatpush3.msra.mxu1 %v393_v17  ;;  %v306_v22 = vld [vmem:[%s3923_s25] sm:$0xff]  ;;  %v2180_v23 = vld [vmem:[%s3922_s5 + $0x38] sm:$0xff]  ;;  %v2179_v24 = vld [vmem:[%s3922_s5 + $0x30] sm:$0xff] }
  0x35   :  { %2287 = vmatprep.subr.mxu0 %v132_v50  ;;  %2398 = vmatprep.subr.mxu1 %v2609_v13  ;;  %v2178_v25 = vld [vmem:[%s3922_s5 + $0x28] sm:$0xff]  ;;  %v2177_v26 = vld [vmem:[%s3922_s5 + $0x20] sm:$0xff]  ;;  %v2193_v27 = vld [vmem:[%s3922_s5 + $0x58] sm:$0xff] }
  0x36   :  { %2288 = vmatpush3.msra.mxu0 %v116_v51  ;;  %2399 = vmatpush3.msra.mxu1 %v392_v19  ;;  %v2192_v28 = vld [vmem:[%s3922_s5 + $0x50] sm:$0xff]  ;;  %v2191_v29 = vld [vmem:[%s3922_s5 + $0x48] sm:$0xff]  ;;  %v2190_v30 = vld [vmem:[%s3922_s5 + $0x40] sm:$0xff] }
  0x37   :  { %2289 = vmatprep.subr.mxu0 %v131_v52  ;;  %2400 = vmatprep.subr.mxu1 %v2609_v13  ;;  %v1437_v31 = vld [vmem:[%s3924_s3] sm:$0x3]  ;;  %v2173_v44 = vld [vmem:[%s3923_s25 + $0x38] sm:$0xff]  ;;  %v2172_v45 = vld [vmem:[%s3923_s25 + $0x30] sm:$0xff] }
  0x38   :  { %2290 = vmatpush3.msra.mxu0 %v115_v53  ;;  %2401 = vmatpush3.msra.mxu1 %v391_v21  ;;  %v1444_v33 = vsub.f32 1.0, %v1437_v31  ;;  %v2166_v37 = vld [vmem:[%s3925_s30] ss:$0 sm:$0xff]  ;;  %v2171_v46 = vld [vmem:[%s3923_s25 + $0x28] sm:$0xff]  ;;  %v2186_v48 = vld [vmem:[%s3923_s25 + $0x58] sm:$0xff] }
  0x39   :  { %2291 = vmatprep.subr.mxu0 %v130_v54  ;;  %2403 = vmatmul.mubr.f32.vlgmr.msra.gmra.mxu1 %v2609_v13  ;;  %v2170_v47 = vld [vmem:[%s3923_s25 + $0x20] sm:$0xff]  ;;  %v2185_v49 = vld [vmem:[%s3923_s25 + $0x50] sm:$0xff]  ;;  %v2184_v50 = vld [vmem:[%s3923_s25 + $0x48] sm:$0xff] }
  0x3a   :  { %2292 = vmatpush3.msra.mxu0 %v114_v55  ;;  %2416 = vmatprep.subr.mxu1 %v2609_v13  ;;  %v2183_v51 = vld [vmem:[%s3923_s25 + $0x40] sm:$0xff]  ;;  %s3926_s25 = sld [smem:[#allocation6_spill]]  ;;  %v2208_v32 = vld [vmem:[%s3898_s11 + $0x38] sm:$0xff] }
  0x3b   :  { %2293 = vmatprep.subr.mxu0 %v129_v56  ;;  %2417 = vmatpush3.msra.mxu1 %v2180_v23  ;;  %v829_v52 = vld [vmem:[%s3896_s9] sm:$0x3f] }
  0x3c   :  { %2294 = vmatpush3.msra.mxu0 %v113_v57  ;;  %2424 = vmatprep.mubr.msk.f32.mxu1 %vm2610_vm0, %v2609_v13 }
  0x3d   :  { %2295 = vmatprep.subr.mxu0 %v128_v58  ;;  %2418 = vmatprep.subr.mxu1 %v2609_v13 }
  0x3e   :  { %2296 = vmatpush3.msra.mxu0 %v112_v59  ;;  %2419 = vmatpush3.msra.mxu1 %v2179_v24 }
  0x3f   :  { %2297 = vmatprep.subr.mxu0 %v127_v60  ;;  %2420 = vmatprep.subr.mxu1 %v2609_v13  ;;  %v919_v60 = vld [vmem:[%s3898_s11 + $0x18] sm:$0xff] }
  0x40   :  { %2298 = vmatpush3.msra.mxu0 %v111_v61  ;;  %2421 = vmatpush3.msra.mxu1 %v2178_v25  ;;  %v828_v53 = vld [vmem:[%s3926_s25] sm:$0x3]  ;;  %v918_v61 = vld [vmem:[%s3898_s11 + $0x10] sm:$0xff] }
  0x41   :  { %2299 = vmatprep.subr.mxu0 %v126_v62  ;;  %2422 = vmatprep.subr.mxu1 %v2609_v13  ;;  %v917_v62 = vld [vmem:[%s3898_s11 + $0x8] sm:$0xff]  ;;  %v2198_v25 = vld [vmem:[%s3897_s10] ss:$0 sm:$0xff]  ;;  %s2612_s10 = smov [#allocation2]  }
  0x42   :  { %2300 = vmatpush3.msra.mxu0 %v110_v63  ;;  %2423 = vmatpush3.msra.mxu1 %v2177_v26  ;;  %v916_v63 = vld [vmem:[%s3898_s11] sm:$0xff]  ;;  %s2156_s6 = sshll.u32 %s2612_s10, 4  ;;  %s2157_s6 = int_to_ptr.vmem [resolvable:$true] %s2156_s6 }
  0x43   :  { %2301 = vmatprep.subr.mxu0 %v125_v0  ;;  %2425 = vmatmul.mubr.f32.vlgmr.msra.gmra.mxu1 %v2609_v13  ;;  %v1003_v0 = vld [vmem:[%s3899_s12 + $0x18] sm:$0xff]  ;;  %s2586_s25 = scalar_lea.vmem %s2157_s6, 32  ;;  %p2591_p1 = scmp.lt.s32.totalorder %s2157_s6, %s2157_s6 }
  0x44   :  { %2302 = vmatpush3.msra.mxu0 %v109_v1  ;;  %2438 = vmatprep.subr.mxu1 %v2609_v13  ;;  %v1002_v1 = vld [vmem:[%s3899_s12 + $0x10] sm:$0xff]  ;;  %p2587_p0 = scmp.ne.s32.totalorder %s2157_s6, %s2586_s25  ;;  %p2592_p2 = scmp.lt.s32.totalorder %s2586_s25, %s2586_s25 }
  0x45   :  { %2303 = vmatprep.subr.mxu0 %v124_v2  ;;  %2446 = vmatprep.mubr.msk.f32.mxu1 %vm2610_vm0, %v2609_v13  ;;  %v1001_v2 = vld [vmem:[%s3899_s12 + $0x8] sm:$0xff] }
  0x46   :  { %2304 = vmatpush3.msra.mxu0 %v108_v3  ;;  %2439 = vmatpush3.msra.mxu1 %v2193_v27  ;;  %v1000_v3 = vld [vmem:[%s3899_s12] sm:$0xff]  ;;  %p2593_p3 = por %p2592_p2, %p2591_p1 }
  0x47   :  { %2305 = vmatprep.subr.mxu0 %v123_v4  ;;  %2440 = vmatprep.subr.mxu1 %v2609_v13  ;;  %v2169_v4 = vld [vmem:[%s3895_s8] ss:$0 sm:$0xff] }
  0x48   :  { %2306 = vmatpush3.msra.mxu0 %v107_v5  ;;  %2441 = vmatpush3.msra.mxu1 %v2192_v28  ;;  %v2167_v5 = vld [vmem:[%s3894_s7] ss:$0 sm:$0xff]  ;;  %p2594_p4 = pnand %p2593_p3, %p2587_p0 }
  0x49   :  { %2307 = vmatprep.subr.mxu0 %v122_v6  ;;  %2442 = vmatprep.subr.mxu1 %v2609_v13 }
  0x4a   :  { %2308 = vmatpush3.msra.mxu0 %v106_v7  ;;  %2443 = vmatpush3.msra.mxu1 %v2191_v29 }
  0x4b   :  { %2309 = vmatprep.subr.mxu0 %v121_v8  ;;  %2444 = vmatprep.subr.mxu1 %v2609_v13 }
  0x4c   :  { %2310 = vmatpush3.msra.mxu0 %v105_v9  ;;  %1440 = vperm.xlu0 %2536, %v1437_v31  }
  0x4d   :  { %2311 = vmatprep.subr.mxu0 %v120_v11  ;;  %2445 = vmatpush3.msra.mxu1 %v2190_v30 }
  0x4e   :  { %2312 = vmatpush3.msra.mxu0 %v104_v12  ;;  %2447 = vmatmul.mubr.f32.vlgmr.msra.gmra.mxu1 %v2609_v13  ;;  %v2182_v12 = vld [vmem:[%s3895_s8 + $0x1] ss:$0 sm:$0xff] }
  0x4f   :  { %300 = vmatmul.mubr.f32.vlgmr.msra.gmra.mxu0 %v2825_v39  ;;  %2383 = vmatprep.subr.mxu0 %v2609_v13 }
  0x50   :  { %2384 = vmatpush3.msra.mxu0 %v309_v16  ;;  %2391 = vmatprep.mubr.msk.f32.mxu0 %vm2610_vm0, %v2609_v13  ;;  %v2175_v16 = vld [vmem:[%s3894_s7 + $0x1] ss:$0 sm:$0xff] }
  0x51   :  { %2385 = vmatprep.subr.mxu0 %v2609_v13  ;;  %2454 = vmatprep.subr.mxu1 %v2609_v13 }
  0x52   :  { %2386 = vmatpush3.msra.mxu0 %v308_v18  ;;  %2462 = vmatprep.mubr.msk.f32.mxu1 %vm2610_vm0, %v2609_v13 }
  0x53   :  { %2387 = vmatprep.subr.mxu0 %v2609_v13  ;;  %1447 = vperm.xlu0 %2536, %v1444_v33   ;;  %v2207_v33 = vld [vmem:[%s3898_s11 + $0x30] sm:$0xff] }
  0x54   :  { %2388 = vmatpush3.msra.mxu0 %v307_v20  ;;  %2455 = vmatpush3.msra.mxu1 %v919_v60  ;;  %v2228_v60 = vld [vmem:[%s3899_s12 + $0x50] sm:$0xff] }
  0x55   :  { %2389 = vmatprep.subr.mxu0 %v2609_v13  ;;  %2456 = vmatprep.subr.mxu1 %v2609_v13 }
  0x56   :  { %2390 = vmatpush3.msra.mxu0 %v306_v22  ;;  %2457 = vmatpush3.msra.mxu1 %v918_v61  ;;  %v2227_v61 = vld [vmem:[%s3899_s12 + $0x48] sm:$0xff] }
  0x57   :  { %2405 = vmatprep.subr.mxu0 %v2609_v13  ;;  %2458 = vmatprep.subr.mxu1 %v2609_v13 }
  0x58   :  { %2459 = vmatpush3.msra.mxu1 %v917_v62  ;;  %v2226_v62 = vld [vmem:[%s3899_s12 + $0x40] sm:$0xff] }
  0x59   :  { %2460 = vmatprep.subr.mxu1 %v2609_v13 }
  0x5a   :  { %2461 = vmatpush3.msra.mxu1 %v916_v63  ;;  %v1455_v63 = vld [vmem:[%s3902_s15 + $0x18] sm:$0xff] }
  0x5b   :  { %2476 = vmatprep.subr.mxu1 %v2609_v13 }
  0xef   :  { %v2278_v34 = vpop.f32.mrf.mxu0 }
  0xf1   :  { %v2279_v35 = vpop.f32.mrf.mxu0 }
  0xf2   :  { %v2280_v36 = vadd.f32 %v2279_v35, %v2278_v34  ;;  %v2206_v34 = vld [vmem:[%s3898_s11 + $0x28] sm:$0xff]  ;;  %v2205_v35 = vld [vmem:[%s3898_s11 + $0x20] sm:$0xff] }
  0xf4   :  { %v232_v40 = vadd.f32 %v2280_v36, %v2166_v37  ;;  %v2195_v37 = vld [vmem:[%s3895_s8 + $0x2] ss:$0 sm:$0xff] }
  0xf9   :  { %v471_v54 = vpop.f32.mrf.mxu1 }
  0xfa   :  { %v472_v6 = vadd.f32 %v2169_v4, %v471_v54 }
  0xfb   :  { %v2404_v55 = vpop.f32.mrf.mxu1 }
  0xfc   :  { %v2215_v55 = vld [vmem:[%s3899_s12 + $0x38] sm:$0xff] }
 0x103   :  { %v637_v56 = vpop.f32.mrf.mxu1 }
 0x104   :  { %v638_v17 = vadd.f32 %v2182_v12, %v637_v56  ;;  %v2214_v56 = vld [vmem:[%s3899_s12 + $0x30] sm:$0xff] }
 0x105   :  { %v2426_v57 = vpop.f32.mrf.mxu1 }
 0x106   :  { %v2213_v57 = vld [vmem:[%s3899_s12 + $0x28] sm:$0xff] }
 0x10e   :  { %v3070_v58 = vpop.f32.mrf.mxu1 }
 0x10f   :  { %v2313_v38 = vpop.f32.mrf.mxu0 }
 0x110   :  { %v2448_v59 = vpop.f32.mrf.mxu1 }
 0x111   :  { %v2314_v39 = vpop.f32.mrf.mxu0  ;;  %v2229_v59 = vld [vmem:[%s3899_s12 + $0x58] sm:$0xff] }
 0x112   :  { %v2315_v41 = vadd.f32 %v2314_v39, %v2313_v38  ;;  %v2222_v38 = vld [vmem:[%s3898_s11 + $0x58] sm:$0xff] }
 0x114   :  { %v302_v42 = vadd.f32 %v2315_v41, %v232_v40  ;;  %v804_v40 = vadd.f32 %v2195_v37, %v3070_v58  ;;  %v2221_v41 = vld [vmem:[%s3898_s11 + $0x50] sm:$0xff]  ;;  %v2212_v58 = vld [vmem:[%s3899_s12 + $0x20] sm:$0xff] }
 0x116   :  { %v305_v43 = vmax.f32 %v302_v42, 0.0  ;;  %v2188_v42 = vld [vmem:[%s3894_s7 + $0x2] ss:$0 sm:$0xff] }
 0x118   :  { %2392 = vmatmul.mubr.msk.f32.vlgmr.msra.gmra.mxu0 %vm317_vm1, %v305_v43 }
 0x119   :  { %2406 = vmatpush3.msra.mxu0 %v2173_v44  ;;  %2413 = vmatprep.mubr.msk.f32.mxu0 %vm2610_vm0, %v2609_v13 }
 0x11a   :  { %2407 = vmatprep.subr.mxu0 %v2609_v13 }
 0x11b   :  { %2408 = vmatpush3.msra.mxu0 %v2172_v45 }
 0x11c   :  { %2409 = vmatprep.subr.mxu0 %v2609_v13 }
 0x11d   :  { %2410 = vmatpush3.msra.mxu0 %v2171_v46 }
 0x11e   :  { %2411 = vmatprep.subr.mxu0 %v2609_v13 }
 0x11f   :  { %2412 = vmatpush3.msra.mxu0 %v2170_v47  ;;  %v2219_v47 = vld [vmem:[%s3898_s11 + $0x40] sm:$0xff] }
 0x120   :  { %2414 = vmatmul.mubr.msk.f32.vlgmr.msra.gmra.mxu0 %vm317_vm1, %v305_v43  ;;  %2427 = vmatprep.subr.mxu0 %v2609_v13 }
 0x121   :  { %2428 = vmatpush3.msra.mxu0 %v2186_v48  ;;  %2435 = vmatprep.mubr.msk.f32.mxu0 %vm2610_vm0, %v2609_v13 }
 0x122   :  { %2429 = vmatprep.subr.mxu0 %v2609_v13 }
 0x123   :  { %2430 = vmatpush3.msra.mxu0 %v2185_v49 }
 0x124   :  { %2431 = vmatprep.subr.mxu0 %v2609_v13 }
 0x125   :  { %2432 = vmatpush3.msra.mxu0 %v2184_v50 }
 0x126   :  { %2433 = vmatprep.subr.mxu0 %v2609_v13 }
 0x127   :  { %2434 = vmatpush3.msra.mxu0 %v2183_v51 }
 0x128   :  { %2436 = vmatmul.mubr.msk.f32.vlgmr.msra.gmra.mxu0 %vm317_vm1, %v305_v43  ;;  %2449 = vmatprep.subr.mxu0 %v2609_v13  ;;  %v2220_v43 = vld [vmem:[%s3898_s11 + $0x48] sm:$0xff] }
 0x129   :  { %2450 = vmatpush3.msk.msra.mxu0 %vm841_vm2, %v829_v52  ;;  %2451 = vmatprep.mubr.msk.f32.mxu0 %vm2610_vm0, %v2609_v13 }
 0x12a   :  { %2465 = vmatprep.subr.mxu0 %v2609_v13 }
 0x12c   :  { %2452 = vmatmul.mubr.msk.f32.vlgmr.msra.gmra.mxu0 %vm837_vm3, %v828_v53 }
 0x12d   :  { %2473 = vmatprep.mubr.msk.f32.mxu0 %vm2610_vm0, %v2609_v13  ;;  %2466 = vmatpush3.msra.mxu0 %v1003_v0  ;;  %v1454_v0 = vld [vmem:[%s3902_s15 + $0x10] sm:$0xff] }
 0x12e   :  { %2467 = vmatprep.subr.mxu0 %v2609_v13 }
 0x12f   :  { %2468 = vmatpush3.msra.mxu0 %v1002_v1  ;;  %v1453_v1 = vld [vmem:[%s3902_s15 + $0x8] sm:$0xff] }
 0x130   :  { %2469 = vmatprep.subr.mxu0 %v2609_v13 }
 0x131   :  { %2470 = vmatpush3.msra.mxu0 %v1001_v2  ;;  %v1452_v2 = vld [vmem:[%s3902_s15] sm:$0xff] }
 0x132   :  { %2471 = vmatprep.subr.mxu0 %v2609_v13 }
 0x133   :  { %2472 = vmatpush3.msra.mxu0 %v1000_v3 }
 0x134   :  { %2487 = vmatprep.subr.mxu0 %v2609_v13 }
 0x1d8   :  { %v387_v7 = vpop.f32.mrf.mxu0 }
 0x1d9   :  { %v388_v8 = vadd.f32 %v2167_v5, %v387_v7 }
 0x1da   :  { %v2393_v9 = vpop.f32.mrf.mxu0 }
 0x1db   :  { %v807_v11 = vadd.f32 %v472_v6, %v388_v8  ;;  %v2201_v9 = vld [vmem:[%s3900_s13] ss:$0 sm:$0xff] }
 0x1dd   :  { %v2196_v14 = vmul.f32 -1.442695, %v807_v11  ;;  %v2203_v11 = vld [vmem:[%s3901_s14] ss:$0 sm:$0xff] }
 0x1df   :  { %2538 = vpow2.f32 %v2196_v14 }
 0x1e0   :  { %v554_v18 = vpop.f32.mrf.mxu0 }
 0x1e1   :  { %v555_v19 = vadd.f32 %v2175_v16, %v554_v18 }
 0x1e2   :  { %v2415_v20 = vpop.f32.mrf.mxu0 }
 0x1e3   :  { %v814_v21 = vadd.f32 %v638_v17, %v555_v19  ;;  %v2210_v19 = vld [vmem:[%s3900_s13 + $0x1] ss:$0 sm:$0xff] }
 0x1e4   :  { %v2217_v20 = vld [vmem:[%s3901_s14 + $0x1] ss:$0 sm:$0xff] }
 0x1e5   :  { %v2197_v22 = vmul.f32 -1.442695, %v814_v21 }
 0x1e7   :  { %2540 = vpow2.f32 %v2197_v22 }
 0x1e8   :  { %v720_v23 = vpop.f32.mrf.mxu0 }
 0x1e9   :  { %v721_v45 = vadd.f32 %v2188_v42, %v720_v23 }
 0x1ea   :  { %v2437_v24 = vpop.f32.mrf.mxu0 }
 0x1ec   :  { %v2539_v26 = vpop.eup %2538  ;;  %v911_v27 = vpop.f32.mrf.mxu0 }
 0x1ed   :  { %v811_v28 = vadd.f32 1.0, %v2539_v26  ;;  %v912_v29 = vadd.f32 %v2198_v25, %v911_v27 }
 0x1ee   :  { %v2453_v30 = vpop.f32.mrf.mxu0 }
 0x1ef   :  { %2542 = vrcp.f32 %v811_v28  ;;  %v915_v31 = vmax.f32 %v912_v29, 0.0 }
 0x1f1   :  { %2463 = vmatmul.mubr.msk.f32.vlgmr.msra.gmra.mxu1 %vm317_vm1, %v915_v31 }
 0x1f2   :  { %2477 = vmatpush3.msra.mxu1 %v2208_v32  ;;  %2484 = vmatprep.mubr.msk.f32.mxu1 %vm2610_vm0, %v2609_v13  ;;  %v2231_v32 = vld [vmem:[%s3901_s14 + $0x2] ss:$0 sm:$0xff] }
 0x1f3   :  { %2478 = vmatprep.subr.mxu1 %v2609_v13 }
 0x1f4   :  { %2479 = vmatpush3.msra.mxu1 %v2207_v33  ;;  %v2541_v36 = vpop.eup %2540 }
 0x1f5   :  { %2480 = vmatprep.subr.mxu1 %v2609_v13  ;;  %v818_v39 = vadd.f32 1.0, %v2541_v36 }
 0x1f6   :  { %2481 = vmatpush3.msra.mxu1 %v2206_v34  ;;  %v2224_v34 = vld [vmem:[%s3900_s13 + $0x2] ss:$0 sm:$0xff] }
 0x1f7   :  { %2482 = vmatprep.subr.mxu1 %v2609_v13  ;;  %2544 = vrcp.f32 %v818_v39 }
 0x1f8   :  { %2483 = vmatpush3.msra.mxu1 %v2205_v35 }
 0x1f9   :  { %2498 = vmatprep.subr.mxu1 %v2609_v13  ;;  %2485 = vmatmul.mubr.msk.f32.vlgmr.msra.gmra.mxu1 %vm317_vm1, %v915_v31 }
 0x1fa   :  { %2499 = vmatpush3.msra.mxu1 %v2222_v38  ;;  %2506 = vmatprep.mubr.msk.f32.mxu1 %vm2610_vm0, %v2609_v13 }
 0x1fb   :  { %2500 = vmatprep.subr.mxu1 %v2609_v13 }
 0x1fc   :  { %v2543_v44 = vpop.eup %2542  ;;  %2501 = vmatpush3.msra.mxu1 %v2221_v41  ;;  %v1441_v41 = vpop.permute.xlu0 %1440 }
 0x1fd   :  { %v821_v46 = vmul.f32 %v2543_v44, %v804_v40  ;;  %2502 = vmatprep.subr.mxu1 %v2609_v13 }
 0x1fe   :  { %2503 = vmatpush3.msra.mxu1 %v2220_v43 }
 0x1ff   :  { %v822_v48 = vadd.f32 %v821_v46, %v721_v45  ;;  %2504 = vmatprep.subr.mxu1 %v2609_v13 }
 0x200   :  { %2505 = vmatpush3.msra.mxu1 %v2219_v47  ;;  %v1448_v46 = vpop.permute.xlu0 %1447 }
 0x201   :  { %2546 = vtanh.f32 %v822_v48  ;;  %2507 = vmatmul.mubr.msk.f32.vlgmr.msra.gmra.mxu1 %vm317_vm1, %v915_v31  ;;  %2520 = vmatprep.subr.mxu1 %v2609_v13 }
 0x202   :  { %2528 = vmatprep.mubr.msk.f32.mxu1 %vm2610_vm0, %v2609_v13  ;;  %2521 = vmatpush3.msra.mxu1 %v1455_v63  ;;  %v1722_v63 = vld [vmem:[%s3906_s19 + $0x2a0] sm:$0xff] }
 0x203   :  { %2522 = vmatprep.subr.mxu1 %v2609_v13 }
 0x204   :  { %v2545_v49 = vpop.eup %2544  ;;  %2523 = vmatpush3.msra.mxu1 %v1454_v0  ;;  %v1717_v0 = vld [vmem:[%s3906_s19 + $0x278] sm:$0xff] }
 0x205   :  { %v824_v50 = vsub.f32 1.0, %v2545_v49  ;;  %v826_v53 = vmul.f32 0.0, %v2545_v49  ;;  %2524 = vmatprep.subr.mxu1 %v2609_v13 }
 0x206   :  { %2525 = vmatpush3.msra.mxu1 %v1453_v1  ;;  %v1716_v1 = vld [vmem:[%s3906_s19 + $0x270] sm:$0xff] }
 0x207   :  { %2526 = vmatprep.subr.mxu1 %v2609_v13 }
 0x208   :  { %2527 = vmatpush3.msra.mxu1 %v1452_v2  ;;  %v1711_v2 = vld [vmem:[%s3906_s19 + $0x248] sm:$0xff] }
 0x20e   :  { %v2547_v51 = vpop.eup %2546 }
 0x20f   :  { %v825_v52 = vmul.f32 %v2547_v51, %v824_v50  ;;  %v1549_v51 = vld [vmem:[%s3904_s17 + $0x38] sm:$0xff] }
 0x211   :  { %v3167_v54 = vadd.f32 %v826_v53, %v825_v52  ;;  %v1548_v52 = vld [vmem:[%s3904_s17 + $0x30] sm:$0xff]  ;;  %v1547_v53 = vld [vmem:[%s3904_s17 + $0x28] sm:$0xff] }
 0x213   :  { %2474 = vmatmul.mubr.msk.f32.vlgmr.msra.gmra.mxu0 %vm317_vm1, %v3167_v54  ;;  %v1450_v48 = vmul.f32 %v1448_v46, %v3167_v54  ;;  %v1777_v46 = vld [vmem:[%s3906_s19 + $0x458] sm:$0xff] }
 0x214   :  { %2488 = vmatpush3.msra.mxu0 %v2215_v55  ;;  %2495 = vmatprep.mubr.msk.f32.mxu0 %vm2610_vm0, %v2609_v13  ;;  %v1545_v55 = vld [vmem:[%s3904_s17 + $0x18] sm:$0xff] }
 0x215   :  { %2489 = vmatprep.subr.mxu0 %v2609_v13 }
 0x216   :  { %2490 = vmatpush3.msra.mxu0 %v2214_v56  ;;  %v1544_v56 = vld [vmem:[%s3904_s17 + $0x10] sm:$0xff] }
 0x217   :  { %2491 = vmatprep.subr.mxu0 %v2609_v13 }
 0x218   :  { %2492 = vmatpush3.msra.mxu0 %v2213_v57  ;;  %v1543_v57 = vld [vmem:[%s3904_s17 + $0x8] sm:$0xff] }
 0x219   :  { %2493 = vmatprep.subr.mxu0 %v2609_v13 }
 0x21a   :  { %2494 = vmatpush3.msra.mxu0 %v2212_v58  ;;  %v1542_v58 = vld [vmem:[%s3904_s17] sm:$0xff] }
 0x21b   :  { %2496 = vmatmul.mubr.msk.f32.vlgmr.msra.gmra.mxu0 %vm317_vm1, %v3167_v54  ;;  %2509 = vmatprep.subr.mxu0 %v2609_v13 }
 0x21c   :  { %2510 = vmatpush3.msra.mxu0 %v2229_v59  ;;  %2517 = vmatprep.mubr.msk.f32.mxu0 %vm2610_vm0, %v2609_v13  ;;  %v1729_v59 = vld [vmem:[%s3906_s19 + $0x2d8] sm:$0xff] }
 0x21d   :  { %2511 = vmatprep.subr.mxu0 %v2609_v13  ;;  %1862 = vmatprep.subr.mxu1 %v1729_v59 }
 0x21e   :  { %2512 = vmatpush3.msra.mxu0 %v2228_v60  ;;  %v1728_v60 = vld [vmem:[%s3906_s19 + $0x2d0] sm:$0xff] }
 0x21f   :  { %2513 = vmatprep.subr.mxu0 %v2609_v13 }
 0x220   :  { %2514 = vmatpush3.msra.mxu0 %v2227_v61  ;;  %v1731_v61 = vld [vmem:[%s3906_s19 + $0x2e8] sm:$0xff] }
 0x221   :  { %2515 = vmatprep.subr.mxu0 %v2609_v13 }
 0x222   :  { %2516 = vmatpush3.msra.mxu0 %v2226_v62  ;;  %v1723_v62 = vld [vmem:[%s3906_s19 + $0x2a8] sm:$0xff] }
 0x223   :  { %2518 = vmatmul.mubr.msk.f32.vlgmr.msra.gmra.mxu0 %vm317_vm1, %v3167_v54  ;;  %1589 = vmatprep.subr.mxu0 %v1549_v51  ;;  %v1764_v51 = vld [vmem:[%s3906_s19 + $0x3f0] sm:$0xff] }
 0x224   :  { %1629 = vmatprep.mubr.f32.mxu0 %v2609_v13  ;;  %1590 = vmatpush1.msra.mxu0 %v1548_v52  ;;  %v1759_v52 = vld [vmem:[%s3906_s19 + $0x3c8] sm:$0xff] }
 0x225   :  { %1591 = vmatprep.subr.mxu0 %v1547_v53  ;;  %v1758_v53 = vld [vmem:[%s3906_s19 + $0x3c0] sm:$0xff] }
 0x2b1   :  { %v996_v3 = vpop.f32.mrf.mxu1 }
 0x2b2   :  { %v997_v12 = vadd.f32 %v2201_v9, %v996_v3  ;;  %v1710_v3 = vld [vmem:[%s3906_s19 + $0x240] sm:$0xff]  ;;  %v1692_v9 = vld [vmem:[%s3906_s19 + $0x1b0] sm:$0xff] }
 0x2b3   :  { %v2464_v4 = vpop.f32.mrf.mxu1 }
 0x2b4   :  { %v1705_v4 = vld [vmem:[%s3906_s19 + $0x218] sm:$0xff] }
 0x2b9   :  { %v1163_v5 = vpop.f32.mrf.mxu1 }
 0x2ba   :  { %v1164_v22 = vadd.f32 %v2210_v19, %v1163_v5  ;;  %v1704_v5 = vld [vmem:[%s3906_s19 + $0x210] sm:$0xff] }
 0x2bb   :  { %v2486_v6 = vpop.f32.mrf.mxu1  ;;  %v1668_v19 = vld [vmem:[%s3906_s19 + $0xf0] sm:$0xff] }
 0x2bc   :  { %v1699_v6 = vld [vmem:[%s3906_s19 + $0x1e8] sm:$0xff] }
 0x2c1   :  { %v1329_v7 = vpop.f32.mrf.mxu1 }
 0x2c2   :  { %v1330_v37 = vadd.f32 %v2224_v34, %v1329_v7  ;;  %v1698_v7 = vld [vmem:[%s3906_s19 + $0x1e0] sm:$0xff]  ;;  %v1813_v34 = vld [vmem:[%s3906_s19 + $0x578] sm:$0xff] }
 0x2c3   :  { %v2508_v8 = vpop.f32.mrf.mxu1 }
 0x2c4   :  { %v1693_v8 = vld [vmem:[%s3906_s19 + $0x1b8] sm:$0xff] }
 0x2d3   :  { %v1080_v14 = vpop.f32.mrf.mxu0 }
 0x2d4   :  { %v1081_v16 = vadd.f32 %v2203_v11, %v1080_v14  ;;  %v1687_v11 = vld [vmem:[%s3906_s19 + $0x188] sm:$0xff]  ;;  %v1681_v14 = vld [vmem:[%s3906_s19 + $0x158] sm:$0xff] }
 0x2d5   :  { %v2475_v17 = vpop.f32.mrf.mxu0 }
 0x2d6   :  { %v1416_v13 = vadd.f32 %v1081_v16, %v997_v12  ;;  %v1686_v12 = vld [vmem:[%s3906_s19 + $0x180] sm:$0xff]  ;;  %v1680_v16 = vld [vmem:[%s3906_s19 + $0x150] sm:$0xff]  ;;  %v1675_v17 = vld [vmem:[%s3906_s19 + $0x128] sm:$0xff] }
 0x2d8   :  { %v2233_v18 = vmul.f32 -1.442695, %v1416_v13  ;;  %v1674_v13 = vld [vmem:[%s3906_s19 + $0x120] sm:$0xff] }
 0x2da   :  { %2548 = vpow2.f32 %v2233_v18  ;;  %v1669_v18 = vld [vmem:[%s3906_s19 + $0xf8] sm:$0xff] }
 0x2db   :  { %v1246_v21 = vpop.f32.mrf.mxu0 }
 0x2dc   :  { %v1247_v23 = vadd.f32 %v2217_v20, %v1246_v21  ;;  %v1663_v20 = vld [vmem:[%s3906_s19 + $0xc8] sm:$0xff]  ;;  %v1662_v21 = vld [vmem:[%s3906_s19 + $0xc0] sm:$0xff] }
 0x2dd   :  { %v2497_v24 = vpop.f32.mrf.mxu0 }
 0x2de   :  { %v1423_v25 = vadd.f32 %v1247_v23, %v1164_v22  ;;  %v1657_v22 = vld [vmem:[%s3906_s19 + $0x98] sm:$0xff]  ;;  %v1656_v23 = vld [vmem:[%s3906_s19 + $0x90] sm:$0xff]  ;;  %v1651_v24 = vld [vmem:[%s3906_s19 + $0x68] sm:$0xff] }
 0x2e0   :  { %v2234_v26 = vmul.f32 -1.442695, %v1423_v25  ;;  %v1650_v25 = vld [vmem:[%s3906_s19 + $0x60] sm:$0xff] }
 0x2e2   :  { %2550 = vpow2.f32 %v2234_v26  ;;  %v1645_v26 = vld [vmem:[%s3906_s19 + $0x38] sm:$0xff] }
 0x2e3   :  { %v1412_v27 = vpop.f32.mrf.mxu0 }
 0x2e4   :  { %v1413_v35 = vadd.f32 %v2231_v32, %v1412_v27  ;;  %v1644_v27 = vld [vmem:[%s3906_s19 + $0x30] sm:$0xff]  ;;  %v1819_v32 = vld [vmem:[%s3906_s19 + $0x5a8] sm:$0xff] }
 0x2e5   :  { %v2519_v28 = vpop.f32.mrf.mxu0 }
 0x2e6   :  { %v1639_v28 = vld [vmem:[%s3906_s19 + $0x8] sm:$0xff] }
 0x2e7   :  { %v2549_v29 = vpop.eup %2548 }
 0x2e8   :  { %v1420_v30 = vadd.f32 1.0, %v2549_v29  ;;  %v1638_v29 = vld [vmem:[%s3906_s19] sm:$0xff] }
 0x2ea   :  { %2552 = vrcp.f32 %v1420_v30  ;;  %v1825_v30 = vld [vmem:[%s3906_s19 + $0x5d8] sm:$0xff] }
 0x2ef   :  { %v2551_v31 = vpop.eup %2550 }
 0x2f0   :  { %v1427_v33 = vadd.f32 1.0, %v2551_v31  ;;  %v1824_v31 = vld [vmem:[%s3906_s19 + $0x5d0] sm:$0xff] }
 0x2f2   :  { %2554 = vrcp.f32 %v1427_v33  ;;  %v1818_v33 = vld [vmem:[%s3906_s19 + $0x5a0] sm:$0xff] }
 0x2f7   :  { %v2553_v36 = vpop.eup %2552 }
 0x2f8   :  { %v1430_v38 = vmul.f32 %v2553_v36, %v1413_v35  ;;  %v1812_v35 = vld [vmem:[%s3906_s19 + $0x570] sm:$0xff]  ;;  %v1807_v36 = vld [vmem:[%s3906_s19 + $0x548] sm:$0xff] }
 0x2fa   :  { %v1431_v39 = vadd.f32 %v1430_v38, %v1330_v37  ;;  %v1806_v37 = vld [vmem:[%s3906_s19 + $0x540] sm:$0xff]  ;;  %v1801_v38 = vld [vmem:[%s3906_s19 + $0x518] sm:$0xff] }
 0x2fc   :  { %2556 = vtanh.f32 %v1431_v39  ;;  %v1800_v39 = vld [vmem:[%s3906_s19 + $0x510] sm:$0xff] }
 0x2ff   :  { %v2555_v40 = vpop.eup %2554 }
 0x300   :  { %v1433_v42 = vsub.f32 1.0, %v2555_v40  ;;  %v1435_v45 = vmul.f32 %v2555_v40, %v3167_v54  ;;  %v1546_v54 = vld [vmem:[%s3904_s17 + $0x20] sm:$0xff]  ;;  %v1795_v40 = vld [vmem:[%s3906_s19 + $0x4e8] sm:$0xff] }
 0x301   :  { %1592 = vmatpush1.msra.mxu0 %v1546_v54  ;;  %v1753_v54 = vld [vmem:[%s3906_s19 + $0x398] sm:$0xff] }
 0x302   :  { %1593 = vmatprep.subr.mxu0 %v1545_v55  ;;  %v2235_v55 = vld [vmem:[%s3903_s16] ss:$0 sm:$0xff] }
 0x303   :  { %1594 = vmatpush1.msra.mxu0 %v1544_v56 }
 0x304   :  { %1595 = vmatprep.subr.mxu0 %v1543_v57 }
 0x305   :  { %1596 = vmatpush1.msra.mxu0 %v1542_v58 }
 0x306   :  { %1933 = vmatprep.subr.mxu0 %v1731_v61 }
 0x309   :  { %v2557_v43 = vpop.eup %2556 }
 0x30a   :  { %v1434_v44 = vmul.f32 %v2557_v43, %v1433_v42  ;;  %v1789_v42 = vld [vmem:[%s3906_s19 + $0x4b8] sm:$0xff]  ;;  %v1788_v43 = vld [vmem:[%s3906_s19 + $0x4b0] sm:$0xff] }
 0x30c   :  { %v1436_v47 = vadd.f32 %v1435_v45, %v1434_v44  ;;  %v1783_v44 = vld [vmem:[%s3906_s19 + $0x488] sm:$0xff]  ;;  %v1782_v45 = vld [vmem:[%s3906_s19 + $0x480] sm:$0xff] }
 0x30e   :  { %v1443_v49 = vmul.f32 %v1441_v41, %v1436_v47  ;;  %v1794_v41 = vld [vmem:[%s3906_s19 + $0x4e0] sm:$0xff]  ;;  %v1776_v47 = vld [vmem:[%s3906_s19 + $0x450] sm:$0xff] }
 0x310   :  { %v1451_v50 = vadd.f32 %v1450_v48, %v1443_v49  ;;  %v1771_v48 = vld [vmem:[%s3906_s19 + $0x428] sm:$0xff]  ;;  %v1770_v49 = vld [vmem:[%s3906_s19 + $0x420] sm:$0xff] }
 0x312   :  { %2529 = vmatmul.mubr.msk.f32.vlgmr.msra.gmra.mxu1 %vm317_vm1, %v1451_v50  ;;  %v1765_v50 = vld [vmem:[%s3906_s19 + $0x3f8] sm:$0xff] }
 0x313   :  { %1863 = vmatpush1.msra.mxu1 %v1728_v60 }
 0x314   :  { %1864 = vmatprep.subr.mxu1 %v1723_v62  ;;  %v1730_v62 = vld [vmem:[%s3906_s19 + $0x2e0] sm:$0xff] }
 0x315   :  { %1865 = vmatpush1.msra.mxu1 %v1722_v63 }
 0x316   :  { %1866 = vmatprep.subr.mxu1 %v1717_v0  ;;  %v1725_v0 = vld [vmem:[%s3906_s19 + $0x2b8] sm:$0xff] }
 0x317   :  { %1867 = vmatpush1.msra.mxu1 %v1716_v1  ;;  %v1724_v1 = vld [vmem:[%s3906_s19 + $0x2b0] sm:$0xff] }
 0x318   :  { %1868 = vmatprep.subr.mxu1 %v1711_v2  ;;  %v1719_v2 = vld [vmem:[%s3906_s19 + $0x288] sm:$0xff] }
 0x319   :  { %1869 = vmatpush1.msra.mxu1 %v1710_v3  ;;  %v1718_v3 = vld [vmem:[%s3906_s19 + $0x280] sm:$0xff] }
 0x31a   :  { %1870 = vmatprep.subr.mxu1 %v1705_v4  ;;  %v1713_v4 = vld [vmem:[%s3906_s19 + $0x258] sm:$0xff] }
 0x31b   :  { %1871 = vmatpush1.msra.mxu1 %v1704_v5  ;;  %v1712_v5 = vld [vmem:[%s3906_s19 + $0x250] sm:$0xff] }
 0x31c   :  { %1872 = vmatprep.subr.mxu1 %v1699_v6  ;;  %v1707_v6 = vld [vmem:[%s3906_s19 + $0x228] sm:$0xff] }
 0x31d   :  { %1873 = vmatpush1.msra.mxu1 %v1698_v7  ;;  %v1706_v7 = vld [vmem:[%s3906_s19 + $0x220] sm:$0xff] }
 0x31e   :  { %1874 = vmatprep.subr.mxu1 %v1693_v8  ;;  %v1701_v8 = vld [vmem:[%s3906_s19 + $0x1f8] sm:$0xff] }
 0x31f   :  { %1875 = vmatpush1.msra.mxu1 %v1692_v9  ;;  %v1700_v9 = vld [vmem:[%s3906_s19 + $0x1f0] sm:$0xff] }
 0x320   :  { %1876 = vmatprep.subr.mxu1 %v1687_v11  ;;  %v1695_v11 = vld [vmem:[%s3906_s19 + $0x1c8] sm:$0xff] }
 0x321   :  { %1877 = vmatpush1.msra.mxu1 %v1686_v12  ;;  %v1694_v12 = vld [vmem:[%s3906_s19 + $0x1c0] sm:$0xff] }
 0x322   :  { %1878 = vmatprep.subr.mxu1 %v1681_v14  ;;  %v1689_v14 = vld [vmem:[%s3906_s19 + $0x198] sm:$0xff] }
 0x323   :  { %1879 = vmatpush1.msra.mxu1 %v1680_v16  ;;  %v1688_v16 = vld [vmem:[%s3906_s19 + $0x190] sm:$0xff] }
 0x324   :  { %1880 = vmatprep.subr.mxu1 %v1675_v17  ;;  %v1683_v17 = vld [vmem:[%s3906_s19 + $0x168] sm:$0xff] }
 0x325   :  { %1881 = vmatpush1.msra.mxu1 %v1674_v13  ;;  %v1682_v13 = vld [vmem:[%s3906_s19 + $0x160] sm:$0xff] }
 0x326   :  { %1882 = vmatprep.subr.mxu1 %v1669_v18  ;;  %v1677_v18 = vld [vmem:[%s3906_s19 + $0x138] sm:$0xff] }
 0x327   :  { %1883 = vmatpush1.msra.mxu1 %v1668_v19  ;;  %v1676_v19 = vld [vmem:[%s3906_s19 + $0x130] sm:$0xff] }
 0x328   :  { %1884 = vmatprep.subr.mxu1 %v1663_v20  ;;  %v1671_v20 = vld [vmem:[%s3906_s19 + $0x108] sm:$0xff] }
 0x329   :  { %1885 = vmatpush1.msra.mxu1 %v1662_v21  ;;  %v1670_v21 = vld [vmem:[%s3906_s19 + $0x100] sm:$0xff] }
 0x32a   :  { %1886 = vmatprep.subr.mxu1 %v1657_v22  ;;  %v1665_v22 = vld [vmem:[%s3906_s19 + $0xd8] sm:$0xff] }
 0x32b   :  { %1887 = vmatpush1.msra.mxu1 %v1656_v23  ;;  %v1664_v23 = vld [vmem:[%s3906_s19 + $0xd0] sm:$0xff] }
 0x32c   :  { %1888 = vmatprep.subr.mxu1 %v1651_v24  ;;  %v1659_v24 = vld [vmem:[%s3906_s19 + $0xa8] sm:$0xff] }
 0x32d   :  { %1889 = vmatpush1.msra.mxu1 %v1650_v25  ;;  %v1658_v25 = vld [vmem:[%s3906_s19 + $0xa0] sm:$0xff] }
 0x32e   :  { %1890 = vmatprep.subr.mxu1 %v1645_v26  ;;  %v1653_v26 = vld [vmem:[%s3906_s19 + $0x78] sm:$0xff] }
 0x32f   :  { %1891 = vmatpush1.msra.mxu1 %v1644_v27  ;;  %v1652_v27 = vld [vmem:[%s3906_s19 + $0x70] sm:$0xff] }
 0x330   :  { %1892 = vmatprep.subr.mxu1 %v1639_v28  ;;  %v1647_v28 = vld [vmem:[%s3906_s19 + $0x48] sm:$0xff] }
 0x331   :  { %1893 = vmatpush1.msra.mxu1 %v1638_v29  ;;  %v1646_v29 = vld [vmem:[%s3906_s19 + $0x40] sm:$0xff] }
 0x332   :  { %1894 = vmatprep.subr.mxu1 %v1825_v30  ;;  %v1641_v30 = vld [vmem:[%s3906_s19 + $0x18] sm:$0xff] }
 0x333   :  { %1895 = vmatpush2.msra.mxu1 %v1824_v31  ;;  %v1640_v31 = vld [vmem:[%s3906_s19 + $0x10] sm:$0xff] }
 0x334   :  { %1896 = vmatprep.subr.mxu1 %v1819_v32  ;;  %v1827_v32 = vld [vmem:[%s3906_s19 + $0x5e8] sm:$0xff] }
 0x335   :  { %1897 = vmatpush2.msra.mxu1 %v1818_v33  ;;  %v1826_v33 = vld [vmem:[%s3906_s19 + $0x5e0] sm:$0xff] }
 0x336   :  { %1898 = vmatprep.subr.mxu1 %v1813_v34  ;;  %v1821_v34 = vld [vmem:[%s3906_s19 + $0x5b8] sm:$0xff] }
 0x337   :  { %1899 = vmatpush2.msra.mxu1 %v1812_v35  ;;  %v1820_v35 = vld [vmem:[%s3906_s19 + $0x5b0] sm:$0xff] }
 0x338   :  { %1900 = vmatprep.subr.mxu1 %v1807_v36  ;;  %v1815_v36 = vld [vmem:[%s3906_s19 + $0x588] sm:$0xff] }
 0x339   :  { %1901 = vmatpush2.msra.mxu1 %v1806_v37  ;;  %v1814_v37 = vld [vmem:[%s3906_s19 + $0x580] sm:$0xff] }
 0x33a   :  { %1902 = vmatprep.subr.mxu1 %v1801_v38  ;;  %v1809_v38 = vld [vmem:[%s3906_s19 + $0x558] sm:$0xff] }
 0x33b   :  { %1903 = vmatpush2.msra.mxu1 %v1800_v39  ;;  %v1808_v39 = vld [vmem:[%s3906_s19 + $0x550] sm:$0xff] }
 0x33c   :  { %1904 = vmatprep.subr.mxu1 %v1795_v40  ;;  %v1803_v40 = vld [vmem:[%s3906_s19 + $0x528] sm:$0xff] }
 0x33d   :  { %1905 = vmatpush2.msra.mxu1 %v1794_v41  ;;  %v1802_v41 = vld [vmem:[%s3906_s19 + $0x520] sm:$0xff] }
 0x33e   :  { %1906 = vmatprep.subr.mxu1 %v1789_v42  ;;  %v1797_v42 = vld [vmem:[%s3906_s19 + $0x4f8] sm:$0xff] }
 0x33f   :  { %1907 = vmatpush2.msra.mxu1 %v1788_v43  ;;  %v1796_v43 = vld [vmem:[%s3906_s19 + $0x4f0] sm:$0xff] }
 0x340   :  { %1908 = vmatprep.subr.mxu1 %v1783_v44  ;;  %v1791_v44 = vld [vmem:[%s3906_s19 + $0x4c8] sm:$0xff] }
 0x341   :  { %1909 = vmatpush2.msra.mxu1 %v1782_v45  ;;  %v1790_v45 = vld [vmem:[%s3906_s19 + $0x4c0] sm:$0xff] }
 0x342   :  { %1910 = vmatprep.subr.mxu1 %v1777_v46  ;;  %v1785_v46 = vld [vmem:[%s3906_s19 + $0x498] sm:$0xff] }
 0x343   :  { %1911 = vmatpush2.msra.mxu1 %v1776_v47  ;;  %v1784_v47 = vld [vmem:[%s3906_s19 + $0x490] sm:$0xff] }
 0x344   :  { %1912 = vmatprep.subr.mxu1 %v1771_v48  ;;  %v1779_v48 = vld [vmem:[%s3906_s19 + $0x468] sm:$0xff] }
 0x345   :  { %1913 = vmatpush2.msra.mxu1 %v1770_v49  ;;  %v1778_v49 = vld [vmem:[%s3906_s19 + $0x460] sm:$0xff] }
 0x346   :  { %1914 = vmatprep.subr.mxu1 %v1765_v50  ;;  %v1773_v50 = vld [vmem:[%s3906_s19 + $0x438] sm:$0xff] }
 0x347   :  { %1915 = vmatpush2.msra.mxu1 %v1764_v51  ;;  %v1772_v51 = vld [vmem:[%s3906_s19 + $0x430] sm:$0xff] }
 0x348   :  { %1916 = vmatprep.subr.mxu1 %v1759_v52  ;;  %v1767_v52 = vld [vmem:[%s3906_s19 + $0x408] sm:$0xff] }
 0x349   :  { %1917 = vmatpush2.msra.mxu1 %v1758_v53  ;;  %v1766_v53 = vld [vmem:[%s3906_s19 + $0x400] sm:$0xff] }
 0x34a   :  { %1918 = vmatprep.subr.mxu1 %v1753_v54  ;;  %v1761_v54 = vld [vmem:[%s3906_s19 + $0x3d8] sm:$0xff] }
 0x3d2   :  { %v1532_v56 = vpop.f32.mrf.mxu1 }
 0x3d3   :  { %v1533_v57 = vadd.f32 %v2235_v55, %v1532_v56  ;;  %v1760_v55 = vld [vmem:[%s3906_s19 + $0x3d0] sm:$0xff] }
 0x3d4   :  { %v2530_v58 = vpop.f32.mrf.mxu1  ;;  %v1752_v56 = vld [vmem:[%s3906_s19 + $0x390] sm:$0xff] }
 0x3d5   :  { %v2237_v59 = vmul.f32 -1.442695, %v1533_v57  ;;  %v1755_v57 = vld [vmem:[%s3906_s19 + $0x3a8] sm:$0xff]  ;;  %1919 = vmatpush2.msra.mxu1 %v1752_v56  ;;  %v1817_v56 = vld [vmem:[%s3906_s19 + $0x598] sm:$0xff] }
 0x3d6   :  { %v1747_v58 = vld [vmem:[%s3906_s19 + $0x368] sm:$0xff] }
 0x3d7   :  { %2558 = vpow2.f32 %v2237_v59  ;;  %v1754_v59 = vld [vmem:[%s3906_s19 + $0x3a0] sm:$0xff]  ;;  %1920 = vmatprep.subr.mxu1 %v1747_v58  ;;  %v1811_v58 = vld [vmem:[%s3906_s19 + $0x568] sm:$0xff] }
 0x3e4   :  { %v2559_v60 = vpop.eup %2558 }
 0x3e5   :  { %v1539_v61 = vadd.f32 1.0, %v2559_v60  ;;  %v1746_v60 = vld [vmem:[%s3906_s19 + $0x360] sm:$0xff] }
 0x3e6   :  { %1921 = vmatpush2.msra.mxu1 %v1746_v60  ;;  %v1805_v60 = vld [vmem:[%s3906_s19 + $0x538] sm:$0xff] }
 0x3e7   :  { %2560 = vrcp.f32 %v1539_v61  ;;  %v1749_v61 = vld [vmem:[%s3906_s19 + $0x378] sm:$0xff] }
 0x3f4   :  { %v2561_v63 = vpop.eup %2560 }
 0x3f5   :  { %2238 = vmatmul.mubr.msk.f32.vlgmr.msra.gmra.mxu0 %vm317_vm1, %v2561_v63  ;;  %2147 = vst.msk [vmem:[#allocation2] sm:$0x3] %vm2146_vm4, %v2561_v63  ;;  %v1748_v63 = vld [vmem:[%s3906_s19 + $0x370] sm:$0xff] }
 0x3f6   :  { %1934 = vmatpush1.msra.mxu0 %v1730_v62  ;;  %v1741_v62 = vld [vmem:[%s3906_s19 + $0x338] sm:$0xff] }
 0x3f7   :  { %1935 = vmatprep.subr.mxu0 %v1725_v0  ;;  %1922 = vmatprep.subr.mxu1 %v1741_v62  ;;  %v1740_v0 = vld [vmem:[%s3906_s19 + $0x330] sm:$0xff]  ;;  %v1799_v62 = vld [vmem:[%s3906_s19 + $0x508] sm:$0xff] }
 0x3f8   :  { %1936 = vmatpush1.msra.mxu0 %v1724_v1  ;;  %v1743_v1 = vld [vmem:[%s3906_s19 + $0x348] sm:$0xff]  ;;  %1923 = vmatpush2.msra.mxu1 %v1740_v0  ;;  %v1793_v0 = vld [vmem:[%s3906_s19 + $0x4d8] sm:$0xff] }
 0x3f9   :  { %1937 = vmatprep.subr.mxu0 %v1719_v2  ;;  %v1735_v2 = vld [vmem:[%s3906_s19 + $0x308] sm:$0xff] }
 0x3fa   :  { %1938 = vmatpush1.msra.mxu0 %v1718_v3  ;;  %v1742_v3 = vld [vmem:[%s3906_s19 + $0x340] sm:$0xff]  ;;  %1924 = vmatprep.subr.mxu1 %v1735_v2  ;;  %v1787_v2 = vld [vmem:[%s3906_s19 + $0x4a8] sm:$0xff] }
 0x3fb   :  { %1939 = vmatprep.subr.mxu0 %v1713_v4  ;;  %v1734_v4 = vld [vmem:[%s3906_s19 + $0x300] sm:$0xff] }
 0x3fc   :  { %1940 = vmatpush1.msra.mxu0 %v1712_v5  ;;  %v1737_v5 = vld [vmem:[%s3906_s19 + $0x318] sm:$0xff]  ;;  %1925 = vmatpush2.msra.mxu1 %v1734_v4 }
 0x3fd   :  { %1941 = vmatprep.subr.mxu0 %v1707_v6  ;;  %v1736_v6 = vld [vmem:[%s3906_s19 + $0x310] sm:$0xff]  ;;  %v1781_v4 = vld [vmem:[%s3906_s19 + $0x478] sm:$0xff] }
 0x3fe   :  { %1942 = vmatpush1.msra.mxu0 %v1706_v7  ;;  %v1733_v7 = vld [vmem:[%s3906_s19 + $0x2f8] sm:$0xff] }
 0x3ff   :  { %1943 = vmatprep.subr.mxu0 %v1701_v8  ;;  %2004 = vmatprep.subr.mxu1 %v1733_v7  ;;  %v1554_v8 = vsub.s32 0, %v2746_v10  ;;  %v1774_v7 = vld [vmem:[%s3906_s19 + $0x440] sm:$0xff] }
 0x400   :  { %1944 = vmatpush1.msra.mxu0 %v1700_v9  ;;  %v1550_v9 = vld [vmem:[%s3905_s18] sm:$0x3] }
 0x401   :  { %1945 = vmatprep.subr.mxu0 %v1695_v11  ;;  %v1558_v11 = vsub.s32 1, %v2746_v10 }
 0x402   :  { %1946 = vmatpush1.msra.mxu0 %v1694_v12  ;;  %v1555_v12 = vrot.slane %v1550_v9, %v1554_v8 }
 0x403   :  { %1947 = vmatprep.subr.mxu0 %v1689_v14  ;;  %v1559_v14 = vrot.slane %v1550_v9, %v1558_v11  ;;  %v1769_v9 = vld [vmem:[%s3906_s19 + $0x418] sm:$0xff] }
 0x404   :  { %1948 = vmatpush1.msra.mxu0 %v1688_v16 }
 0x405   :  { %1949 = vmatprep.subr.mxu0 %v1683_v17 }
 0x406   :  { %1950 = vmatpush1.msra.mxu0 %v1682_v13 }
 0x407   :  { %1951 = vmatprep.subr.mxu0 %v1677_v18 }
 0x408   :  { %1952 = vmatpush1.msra.mxu0 %v1676_v19 }
 0x409   :  { %1953 = vmatprep.subr.mxu0 %v1671_v20 }
 0x40a   :  { %1954 = vmatpush1.msra.mxu0 %v1670_v21  ;;  %v1732_v21 = vld [vmem:[%s3906_s19 + $0x2f0] sm:$0xff] }
 0x40b   :  { %1955 = vmatprep.subr.mxu0 %v1665_v22  ;;  %v1727_v22 = vld [vmem:[%s3906_s19 + $0x2c8] sm:$0xff] }
 0x40c   :  { %1956 = vmatpush1.msra.mxu0 %v1664_v23  ;;  %v1726_v23 = vld [vmem:[%s3906_s19 + $0x2c0] sm:$0xff] }
 0x40d   :  { %1957 = vmatprep.subr.mxu0 %v1659_v24  ;;  %v1721_v24 = vld [vmem:[%s3906_s19 + $0x298] sm:$0xff] }
 0x40e   :  { %1958 = vmatpush1.msra.mxu0 %v1658_v25  ;;  %v1720_v25 = vld [vmem:[%s3906_s19 + $0x290] sm:$0xff] }
 0x40f   :  { %1959 = vmatprep.subr.mxu0 %v1653_v26  ;;  %v1715_v26 = vld [vmem:[%s3906_s19 + $0x268] sm:$0xff] }
 0x410   :  { %1960 = vmatpush1.msra.mxu0 %v1652_v27  ;;  %v1714_v27 = vld [vmem:[%s3906_s19 + $0x260] sm:$0xff] }
 0x411   :  { %1961 = vmatprep.subr.mxu0 %v1647_v28  ;;  %v1709_v28 = vld [vmem:[%s3906_s19 + $0x238] sm:$0xff] }
 0x412   :  { %1962 = vmatpush1.msra.mxu0 %v1646_v29  ;;  %v1708_v29 = vld [vmem:[%s3906_s19 + $0x230] sm:$0xff] }
 0x413   :  { %1963 = vmatprep.subr.mxu0 %v1641_v30  ;;  %v1703_v30 = vld [vmem:[%s3906_s19 + $0x208] sm:$0xff] }
 0x414   :  { %1964 = vmatpush1.msra.mxu0 %v1640_v31  ;;  %v1702_v31 = vld [vmem:[%s3906_s19 + $0x200] sm:$0xff] }
 0x415   :  { %1965 = vmatprep.subr.mxu0 %v1827_v32  ;;  %v1697_v32 = vld [vmem:[%s3906_s19 + $0x1d8] sm:$0xff] }
 0x416   :  { %1966 = vmatpush2.msra.mxu0 %v1826_v33  ;;  %v1696_v33 = vld [vmem:[%s3906_s19 + $0x1d0] sm:$0xff] }
 0x417   :  { %1967 = vmatprep.subr.mxu0 %v1821_v34  ;;  %v1691_v34 = vld [vmem:[%s3906_s19 + $0x1a8] sm:$0xff] }
 0x418   :  { %1968 = vmatpush2.msra.mxu0 %v1820_v35  ;;  %v1690_v35 = vld [vmem:[%s3906_s19 + $0x1a0] sm:$0xff] }
 0x419   :  { %1969 = vmatprep.subr.mxu0 %v1815_v36  ;;  %v1685_v36 = vld [vmem:[%s3906_s19 + $0x178] sm:$0xff] }
 0x41a   :  { %1970 = vmatpush2.msra.mxu0 %v1814_v37  ;;  %v1684_v37 = vld [vmem:[%s3906_s19 + $0x170] sm:$0xff] }
 0x41b   :  { %1971 = vmatprep.subr.mxu0 %v1809_v38  ;;  %v1679_v38 = vld [vmem:[%s3906_s19 + $0x148] sm:$0xff] }
 0x41c   :  { %1972 = vmatpush2.msra.mxu0 %v1808_v39  ;;  %v1678_v39 = vld [vmem:[%s3906_s19 + $0x140] sm:$0xff] }
 0x41d   :  { %1973 = vmatprep.subr.mxu0 %v1803_v40  ;;  %v1673_v40 = vld [vmem:[%s3906_s19 + $0x118] sm:$0xff] }
 0x41e   :  { %1974 = vmatpush2.msra.mxu0 %v1802_v41  ;;  %v1672_v41 = vld [vmem:[%s3906_s19 + $0x110] sm:$0xff] }
 0x41f   :  { %1975 = vmatprep.subr.mxu0 %v1797_v42  ;;  %v1667_v42 = vld [vmem:[%s3906_s19 + $0xe8] sm:$0xff] }
 0x420   :  { %1976 = vmatpush2.msra.mxu0 %v1796_v43  ;;  %v1666_v43 = vld [vmem:[%s3906_s19 + $0xe0] sm:$0xff] }
 0x421   :  { %1977 = vmatprep.subr.mxu0 %v1791_v44  ;;  %v1661_v44 = vld [vmem:[%s3906_s19 + $0xb8] sm:$0xff] }
 0x422   :  { %1978 = vmatpush2.msra.mxu0 %v1790_v45  ;;  %v1660_v45 = vld [vmem:[%s3906_s19 + $0xb0] sm:$0xff] }
 0x423   :  { %1979 = vmatprep.subr.mxu0 %v1785_v46  ;;  %v1655_v46 = vld [vmem:[%s3906_s19 + $0x88] sm:$0xff] }
 0x424   :  { %1980 = vmatpush2.msra.mxu0 %v1784_v47  ;;  %v1654_v47 = vld [vmem:[%s3906_s19 + $0x80] sm:$0xff] }
 0x425   :  { %1981 = vmatprep.subr.mxu0 %v1779_v48  ;;  %v1649_v48 = vld [vmem:[%s3906_s19 + $0x58] sm:$0xff] }
 0x426   :  { %1982 = vmatpush2.msra.mxu0 %v1778_v49  ;;  %v1648_v49 = vld [vmem:[%s3906_s19 + $0x50] sm:$0xff] }
 0x427   :  { %1983 = vmatprep.subr.mxu0 %v1773_v50  ;;  %v1643_v50 = vld [vmem:[%s3906_s19 + $0x28] sm:$0xff] }
 0x428   :  { %1984 = vmatpush2.msra.mxu0 %v1772_v51  ;;  %v1642_v51 = vld [vmem:[%s3906_s19 + $0x20] sm:$0xff] }
 0x429   :  { %1985 = vmatprep.subr.mxu0 %v1767_v52  ;;  %v1829_v52 = vld [vmem:[%s3906_s19 + $0x5f8] sm:$0xff] }
 0x42a   :  { %1986 = vmatpush2.msra.mxu0 %v1766_v53  ;;  %v1828_v53 = vld [vmem:[%s3906_s19 + $0x5f0] sm:$0xff] }
 0x42b   :  { %1987 = vmatprep.subr.mxu0 %v1761_v54  ;;  %v1823_v54 = vld [vmem:[%s3906_s19 + $0x5c8] sm:$0xff] }
 0x42c   :  { %1988 = vmatpush2.msra.mxu0 %v1760_v55  ;;  %v1822_v55 = vld [vmem:[%s3906_s19 + $0x5c0] sm:$0xff] }
 0x42d   :  { %1989 = vmatprep.subr.mxu0 %v1755_v57  ;;  %v1816_v57 = vld [vmem:[%s3906_s19 + $0x590] sm:$0xff] }
 0x42e   :  { %1990 = vmatpush2.msra.mxu0 %v1754_v59  ;;  %v1810_v59 = vld [vmem:[%s3906_s19 + $0x560] sm:$0xff] }
 0x42f   :  { %1991 = vmatprep.subr.mxu0 %v1749_v61  ;;  %v1804_v61 = vld [vmem:[%s3906_s19 + $0x530] sm:$0xff] }
 0x430   :  { %1992 = vmatpush2.msra.mxu0 %v1748_v63  ;;  %v1798_v63 = vld [vmem:[%s3906_s19 + $0x500] sm:$0xff] }
 0x431   :  { %1993 = vmatprep.subr.mxu0 %v1743_v1  ;;  %v1792_v1 = vld [vmem:[%s3906_s19 + $0x4d0] sm:$0xff] }
 0x432   :  { %1994 = vmatpush2.msra.mxu0 %v1742_v3  ;;  %v1786_v3 = vld [vmem:[%s3906_s19 + $0x4a0] sm:$0xff] }
 0x433   :  { %1995 = vmatprep.subr.mxu0 %v1737_v5  ;;  %v1780_v5 = vld [vmem:[%s3906_s19 + $0x470] sm:$0xff] }
 0x434   :  { %1996 = vmatpush2.msra.mxu0 %v1736_v6  ;;  %v1775_v6 = vld [vmem:[%s3906_s19 + $0x448] sm:$0xff] }
 0x4b5   :  { %v1631_v16 = vpop.f32.mrf.mxu0 }
 0x4b6   :  { %v1632_v17 = vadd.f32 %v1631_v16, %v1555_v12  ;;  %v1768_v12 = vld [vmem:[%s3906_s19 + $0x410] sm:$0xff]  ;;  %v1762_v16 = vld [vmem:[%s3906_s19 + $0x3e0] sm:$0xff] }
 0x4b7   :  { %v1633_v13 = vpop.f32.mrf.mxu0 }
 0x4b8   :  { %v1634_v18 = vadd.f32 %v1633_v13, %v1559_v14  ;;  %v3671_v20 = vmax.f32 %v1632_v17, 0.0  ;;  %v1763_v14 = vld [vmem:[%s3906_s19 + $0x3e8] sm:$0xff]  ;;  %v1757_v17 = vld [vmem:[%s3906_s19 + $0x3b8] sm:$0xff]  ;;  %v1756_v13 = vld [vmem:[%s3906_s19 + $0x3b0] sm:$0xff] }
 0x4ba   :  { %v1637_v19 = vmax.f32 %v1634_v18, 0.0  ;;  %v1751_v18 = vld [vmem:[%s3906_s19 + $0x388] sm:$0xff] }
 0x4bc   :  { %1926 = vmatprep.mubr.f32.mxu1 %v1637_v19  ;;  %1997 = vmatprep.mubr.f32.mxu0 %v1637_v19 }
 0x4bd   :  { %1927 = vmatmul.mubr.f32.vlgmr.msra.gmra.mxu1 %v3671_v20  ;;  %1998 = vmatmul.mubr.f32.vlgmr.msra.gmra.mxu0 %v3671_v20 }
 0x4be   :  { %2005 = vmatpush1.msra.mxu1 %v1732_v21  ;;  %2068 = vmatprep.mubr.f32.mxu1 %v1637_v19  ;;  %v1750_v19 = vld [vmem:[%s3906_s19 + $0x380] sm:$0xff]  ;;  %v1745_v21 = vld [vmem:[%s3906_s19 + $0x358] sm:$0xff] }
 0x4bf   :  { %2006 = vmatprep.subr.mxu1 %v1727_v22  ;;  %v1744_v22 = vld [vmem:[%s3906_s19 + $0x350] sm:$0xff] }
 0x4c0   :  { %2007 = vmatpush1.msra.mxu1 %v1726_v23  ;;  %v1739_v23 = vld [vmem:[%s3906_s19 + $0x328] sm:$0xff] }
 0x4c1   :  { %2008 = vmatprep.subr.mxu1 %v1721_v24  ;;  %v1738_v24 = vld [vmem:[%s3906_s19 + $0x320] sm:$0xff] }
 0x4c2   :  { %2009 = vmatpush1.msra.mxu1 %v1720_v25 }
 0x4c3   :  { %2010 = vmatprep.subr.mxu1 %v1715_v26 }
 0x4c4   :  { %2011 = vmatpush1.msra.mxu1 %v1714_v27 }
 0x4c5   :  { %2012 = vmatprep.subr.mxu1 %v1709_v28 }
 0x4c6   :  { %2013 = vmatpush1.msra.mxu1 %v1708_v29 }
 0x4c7   :  { %2014 = vmatprep.subr.mxu1 %v1703_v30 }
 0x4c8   :  { %2015 = vmatpush1.msra.mxu1 %v1702_v31 }
 0x4c9   :  { %2016 = vmatprep.subr.mxu1 %v1697_v32 }
 0x4ca   :  { %2017 = vmatpush1.msra.mxu1 %v1696_v33 }
 0x4cb   :  { %2018 = vmatprep.subr.mxu1 %v1691_v34 }
 0x4cc   :  { %2019 = vmatpush1.msra.mxu1 %v1690_v35 }
 0x4cd   :  { %2020 = vmatprep.subr.mxu1 %v1685_v36 }
 0x4ce   :  { %2021 = vmatpush1.msra.mxu1 %v1684_v37 }
 0x4cf   :  { %2022 = vmatprep.subr.mxu1 %v1679_v38 }
 0x4d0   :  { %2023 = vmatpush1.msra.mxu1 %v1678_v39 }
 0x4d1   :  { %2024 = vmatprep.subr.mxu1 %v1673_v40 }
 0x4d2   :  { %2025 = vmatpush1.msra.mxu1 %v1672_v41 }
 0x4d3   :  { %2026 = vmatprep.subr.mxu1 %v1667_v42 }
 0x4d4   :  { %2027 = vmatpush1.msra.mxu1 %v1666_v43 }
 0x4d5   :  { %2028 = vmatprep.subr.mxu1 %v1661_v44 }
 0x4d6   :  { %2029 = vmatpush1.msra.mxu1 %v1660_v45 }
 0x4d7   :  { %2030 = vmatprep.subr.mxu1 %v1655_v46 }
 0x4d8   :  { %2031 = vmatpush1.msra.mxu1 %v1654_v47 }
 0x4d9   :  { %2032 = vmatprep.subr.mxu1 %v1649_v48 }
 0x4da   :  { %2033 = vmatpush1.msra.mxu1 %v1648_v49 }
 0x4db   :  { %2034 = vmatprep.subr.mxu1 %v1643_v50 }
 0x4dc   :  { %2035 = vmatpush1.msra.mxu1 %v1642_v51 }
 0x4dd   :  { %2036 = vmatprep.subr.mxu1 %v1829_v52 }
 0x4de   :  { %2037 = vmatpush2.msra.mxu1 %v1828_v53 }
 0x4df   :  { %2038 = vmatprep.subr.mxu1 %v1823_v54 }
 0x4e0   :  { %2039 = vmatpush2.msra.mxu1 %v1822_v55 }
 0x4e1   :  { %2040 = vmatprep.subr.mxu1 %v1817_v56 }
 0x4e2   :  { %2041 = vmatpush2.msra.mxu1 %v1816_v57 }
 0x4e3   :  { %2042 = vmatprep.subr.mxu1 %v1811_v58 }
 0x4e4   :  { %2043 = vmatpush2.msra.mxu1 %v1810_v59 }
 0x4e5   :  { %2044 = vmatprep.subr.mxu1 %v1805_v60 }
 0x4e6   :  { %2045 = vmatpush2.msra.mxu1 %v1804_v61 }
 0x4e7   :  { %2046 = vmatprep.subr.mxu1 %v1799_v62 }
 0x4e8   :  { %2047 = vmatpush2.msra.mxu1 %v1798_v63 }
 0x4e9   :  { %2048 = vmatprep.subr.mxu1 %v1793_v0 }
 0x4ea   :  { %2049 = vmatpush2.msra.mxu1 %v1792_v1 }
 0x4eb   :  { %2050 = vmatprep.subr.mxu1 %v1787_v2 }
 0x4ec   :  { %2051 = vmatpush2.msra.mxu1 %v1786_v3 }
 0x4ed   :  { %2052 = vmatprep.subr.mxu1 %v1781_v4 }
 0x4ee   :  { %2053 = vmatpush2.msra.mxu1 %v1780_v5 }
 0x4ef   :  { %2054 = vmatprep.subr.mxu1 %v1775_v6 }
 0x4f0   :  { %2055 = vmatpush2.msra.mxu1 %v1774_v7 }
 0x4f1   :  { %2056 = vmatprep.subr.mxu1 %v1769_v9 }
 0x4f2   :  { %2057 = vmatpush2.msra.mxu1 %v1768_v12 }
 0x4f3   :  { %2058 = vmatprep.subr.mxu1 %v1763_v14 }
 0x4f4   :  { %2059 = vmatpush2.msra.mxu1 %v1762_v16 }
 0x4f5   :  { %2060 = vmatprep.subr.mxu1 %v1757_v17 }
 0x4f6   :  { %2061 = vmatpush2.msra.mxu1 %v1756_v13 }
 0x4f7   :  { %2062 = vmatprep.subr.mxu1 %v1751_v18 }
 0x4f8   :  { %2063 = vmatpush2.msra.mxu1 %v1750_v19 }
 0x4f9   :  { %2064 = vmatprep.subr.mxu1 %v1745_v21 }
 0x4fa   :  { %2065 = vmatpush2.msra.mxu1 %v1744_v22 }
 0x4fb   :  { %2066 = vmatprep.subr.mxu1 %v1739_v23 }
 0x4fc   :  { %2067 = vmatpush2.msra.mxu1 %v1738_v24 }
 0x4fd   :  { %2069 = vmatmul.mubr.f32.vlgmr.msra.gmra.mxu1 %v3671_v20 }
 0x4fe   :  { %2597 = shalt.err (!%p2594_p4)
}
 0x4ff   :  { %2159 = dma.vmem_to_hbm [thread:$0]  %s2157_s6, 32, %s3909_s22, [#allocation3]   ;;  %v1842_v25 = vsub.s32 2, %v2746_v10  ;;  %v1830_v20 = vld [vmem:[%s3907_s20] sm:$0x3f]  ;;  %v1846_v26 = vsub.s32 3, %v2746_v10 }
 0x500   :  { %v1835_v27 = vrot.slane %v1830_v20, %v1554_v8  ;;  %v1839_v29 = vrot.slane %v1830_v20, %v1558_v11  ;;  %v1850_v58 = vsub.s32 4, %v2746_v10  ;;  %v1854_v59 = vsub.s32 5, %v2746_v10 }
 0x501   :  { %v1843_v28 = vrot.slane %v1830_v20, %v1842_v25  ;;  %v1847_v30 = vrot.slane %v1830_v20, %v1846_v26 }
 0x502   :  { %v1851_v60 = vrot.slane %v1830_v20, %v1850_v58  ;;  %v1855_v61 = vrot.slane %v1830_v20, %v1854_v59 }
 0x57d   :  { %v1928_v31 = vpop.f32.mrf.mxu1  ;;  %v1999_v32 = vpop.f32.mrf.mxu0 }
 0x57e   :  { %v1929_v33 = vadd.f32 %v1928_v31, %v1835_v27  ;;  %v2000_v34 = vadd.f32 %v1999_v32, %v1843_v28 }
 0x57f   :  { %v1930_v35 = vpop.f32.mrf.mxu1  ;;  %v2001_v36 = vpop.f32.mrf.mxu0 }
 0x580   :  { %v2239_v37 = vmul.f32 -1.442695, %v1929_v33  ;;  %v2241_v38 = vmul.f32 -1.442695, %v2000_v34  ;;  %v1931_v39 = vadd.f32 %v1930_v35, %v1839_v29  ;;  %v2002_v40 = vadd.f32 %v2001_v36, %v1847_v30 }
 0x582   :  { %2562 = vpow2.f32 %v2239_v37  ;;  %v2240_v41 = vmul.f32 -1.442695, %v1931_v39  ;;  %v2242_v42 = vmul.f32 -1.442695, %v2002_v40 }
 0x583   :  { %2564 = vpow2.f32 %v2241_v38 }
 0x584   :  { %2566 = vpow2.f32 %v2240_v41 }
 0x585   :  { %2568 = vpow2.f32 %v2242_v42 }
 0x58f   :  { %v2563_v8 = vpop.eup %2562 }
 0x590   :  { %v2565_v43 = vpop.eup %2564  ;;  %v2093_v11 = vadd.f32 1.0, %v2563_v8 }
 0x591   :  { %v2567_v44 = vpop.eup %2566  ;;  %v2095_v45 = vadd.f32 1.0, %v2565_v43 }
 0x592   :  { %v2569_v46 = vpop.eup %2568  ;;  %2570 = vrcp.f32 %v2093_v11  ;;  %v2094_v47 = vadd.f32 1.0, %v2567_v44 }
 0x593   :  { %2572 = vrcp.f32 %v2095_v45  ;;  %v2096_v48 = vadd.f32 1.0, %v2569_v46 }
 0x594   :  { %2574 = vrcp.f32 %v2094_v47 }
 0x595   :  { %2576 = vrcp.f32 %v2096_v48 }
 0x59f   :  { %v2571_v49 = vpop.eup %2570 }
 0x5a0   :  { %v2573_v50 = vpop.eup %2572 }
 0x5a1   :  { %v2575_v51 = vpop.eup %2574 }
 0x5a2   :  { %v2577_v52 = vpop.eup %2576  ;;  %v2117_v53 = vcombine.low %v2571_v49, %v2575_v51 }
 0x5a3   :  { %v2118_v54 = vcombine.low %v2573_v50, %v2577_v52 }
 0x5a4   :  { %v2125_v55 = vrot.slane %v2117_v53, %v2761_v15 }
 0x5a5   :  { %v2132_v56 = vrot.slane %v2118_v54, %v2761_v15 }
 0x5a7   :  { %v2133_v57 = vcombine.low %v2125_v55, %v2132_v56 }
 0x5a9   :  { %2144 = vst [vmem:[%s3908_s21] sm:$0xff] %v2133_v57 }
 0x5bd   :  { %v2070_v62 = vpop.f32.mrf.mxu1 }
 0x5be   :  { %v2071_v63 = vadd.f32 %v2070_v62, %v1851_v60 }
 0x5bf   :  { %v2072_v0 = vpop.f32.mrf.mxu1 }
 0x5c0   :  { %v2243_v1 = vmul.f32 -1.442695, %v2071_v63  ;;  %v2073_v2 = vadd.f32 %v2072_v0, %v1855_v61 }
 0x5c2   :  { %2578 = vpow2.f32 %v2243_v1  ;;  %v2244_v3 = vmul.f32 -1.442695, %v2073_v2 }
 0x5c4   :  { %2580 = vpow2.f32 %v2244_v3 }
 0x5cf   :  { %v2579_v15 = vpop.eup %2578 }
 0x5d0   :  { %v2097_v4 = vadd.f32 1.0, %v2579_v15 }
 0x5d1   :  { %v2581_v5 = vpop.eup %2580 }
 0x5d2   :  { %v2098_v6 = vadd.f32 1.0, %v2581_v5  ;;  %2582 = vrcp.f32 %v2097_v4 }
 0x5d4   :  { %2584 = vrcp.f32 %v2098_v6 }
 0x5df   :  { %v2583_v7 = vpop.eup %2582 }
 0x5e1   :  { %v2585_v9 = vpop.eup %2584 }
 0x5e2   :  { %v2134_v12 = vcombine.low %v2583_v7, %v2585_v9 }
 0x5e4   :  { %2245 = vst.sshfl [vmem:[%s3908_s21 + $0x8] sm:$0x33 pattern:$0x76325410] %v2134_v12 }
 0x5e5   :  { %2606 = dma.done.wait [#allocation3], 32  }
 0x5e6   :  { %2607 = vsyncadd [#allocation3], 4294967264 }
 0x5e7   :  { %2165 = vsyncpa [#allocation3], 1 }

</bundles_post_ra>
